<compile_context>
chip_gen: v7x
topology: tpu7x:2x2x1
jax: 0.10.0
libtpu: 0.0.40
codegen_flags: <defaults>
</compile_context>

<pallas_src>
import jax
import jax.numpy as jnp
from jax.experimental import pallas as pl
from jax.experimental.pallas import tpu as pltpu

K_IN = 500          # real feature dim
K_PAD = 512         # padded contraction dim (multiple of 128)
MAX_TB = 256        # batch tile (rows per grid step)


def mlp_kernel(x_ref, w1_ref, b1_ref, w2_ref, b2_ref, w3_ref, b3_ref, o_ref):
    # fc1 + ReLU : (TB,512) @ (512,64) on the MXU, bf16 operands, f32 accumulate.
    x_bf = x_ref[...].astype(jnp.bfloat16)
    h1 = jnp.dot(x_bf, w1_ref[...], preferred_element_type=jnp.float32)
    h1 = jnp.maximum(h1 + b1_ref[...], 0.0)

    # fc2 + ReLU : (TB,64) @ (64,32) on the MXU.
    h2 = jnp.dot(h1.astype(jnp.bfloat16), w2_ref[...],
                 preferred_element_type=jnp.float32)
    h2 = jnp.maximum(h2 + b2_ref[...], 0.0)

    # fc3 : N=1 matmul -> VPU multiply + XLU lane-reduce (skip the MXU entirely).
    z = jnp.sum(h2 * w3_ref[...], axis=-1, keepdims=True) + b3_ref[0, 0]

    # sigmoid: exp + approximate reciprocal both ride the EUP slot.
    s = pl.reciprocal(1.0 + jnp.exp(-z), approx=True)

    # Lane-dense store: broadcast the single column across all 128 lanes.
    o_ref[...] = jnp.broadcast_to(s, o_ref.shape)


def net_forward(x, kernel_params):
    """x: (B, 500) f32.  Returns (B, 1) f32 sigmoid output."""
    w1, b1, w2, b2, w3, b3 = kernel_params
    B = x.shape[0]

    # Pad contraction dim 500 -> 512 (w1 is already padded with zero rows).
    if x.shape[1] < K_PAD:
        x = jnp.pad(x, ((0, 0), (0, K_PAD - x.shape[1])))

    # Choose batch tile (multiple of 8) and pad batch up to a multiple of it.
    TB = min(MAX_TB, ((B + 7) // 8) * 8)
    Bp = ((B + TB - 1) // TB) * TB
    if Bp != B:
        x = jnp.pad(x, ((0, Bp - B), (0, 0)))
    grid = (Bp // TB,)

    resident = lambda a: pl.BlockSpec(a.shape, lambda i: (0, 0))  # weights stay in VMEM

    out = pl.pallas_call(
        mlp_kernel,
        out_shape=jax.ShapeDtypeStruct((Bp, 128), jnp.float32),
        grid=grid,
        in_specs=[
            pl.BlockSpec((TB, K_PAD), lambda i: (i, 0)),              # x: batch-tiled
            resident(w1), resident(b1),
            resident(w2), resident(b2),
            resident(w3),
            pl.BlockSpec(memory_space=pltpu.MemorySpace.SMEM),        # b3 scalar
        ],
        out_specs=pl.BlockSpec((TB, 128), lambda i: (i, 0)),
        compiler_params=pltpu.CompilerParams(
            dimension_semantics=("parallel",)),
    )(x, w1, b1, w2, b2, w3, b3)

    return out[:B, :1]


def init_params(key):
    """f32 reference params mimicking nn.Linear default init; W stored as (in, out)."""
    ks = jax.random.split(key, 6)

    def lin(kw, kb, fan_in, fan_out):
        bound = 1.0 / jnp.sqrt(fan_in)
        w = jax.random.uniform(kw, (fan_in, fan_out), jnp.float32, -bound, bound)
        b = jax.random.uniform(kb, (fan_out,), jnp.float32, -bound, bound)
        return w, b

    w1, b1 = lin(ks[0], ks[1], 500, 64)
    w2, b2 = lin(ks[2], ks[3], 64, 32)
    w3, b3 = lin(ks[4], ks[5], 32, 1)
    return (w1, b1, w2, b2, w3, b3)


def pack_params(params):
    """Kernel-side layout: pad w1 to K_PAD rows, bf16 MXU weights, row-vector biases,
    w3 as a (1, 32) row for the VPU reduce, b3 as a (1, 1) SMEM scalar."""
    w1, b1, w2, b2, w3, b3 = params
    w1p = jnp.pad(w1, ((0, K_PAD - w1.shape[0]), (0, 0))).astype(jnp.bfloat16)
    w2p = w2.astype(jnp.bfloat16)
    return (w1p, b1.reshape(1, -1).astype(jnp.float32),
            w2p, b2.reshape(1, -1).astype(jnp.float32),
            w3.reshape(1, -1).astype(jnp.float32),
            b3.reshape(1, 1).astype(jnp.float32))


if __name__ == "__main__":
    key = jax.random.PRNGKey(0)
    kx, kp = jax.random.split(key)

    B = 300  # exercises both the batch grid (2 tiles of 256) and row padding
    x = jax.random.normal(kx, (B, K_IN), jnp.float32)
    params = init_params(kp)
    kernel_params = pack_params(params)

    out = net_forward(x, kernel_params)
    out = jax.block_until_ready(out)

    # Pure-JAX f32 reference (same math as the PyTorch module).
    w1, b1, w2, b2, w3, b3 = params
    h = jnp.maximum(x @ w1 + b1, 0.0)
    h = jnp.maximum(h @ w2 + b2, 0.0)
    ref = jax.nn.sigmoid(h @ w3 + b3)

    assert out.shape == (B, 1), out.shape
    # bf16 MXU operands + approx reciprocal -> small deviation from the f32 reference.
    assert jnp.allclose(out, ref, atol=2e-2), float(jnp.max(jnp.abs(out - ref)))
    print("KERNEL_OK")
</pallas_src>

<mosaic_0001>
module attributes {stable_mosaic.version = 11 : i64} {
  func.func @mlp_kernel(%arg0: i32, %arg1: memref<256x512xf32, #tpu.memory_space<vmem>>, %arg2: memref<512x64xbf16, #tpu.memory_space<vmem>>, %arg3: memref<1x64xf32, #tpu.memory_space<vmem>>, %arg4: memref<64x32xbf16, #tpu.memory_space<vmem>>, %arg5: memref<1x32xf32, #tpu.memory_space<vmem>>, %arg6: memref<1x32xf32, #tpu.memory_space<vmem>>, %arg7: memref<1x1xf32, #tpu.memory_space<smem>>, %arg8: memref<256x128xf32, #tpu.memory_space<vmem>>) attributes {dimension_semantics = [#tpu.dimension_semantics<parallel>], iteration_bounds = array<i64: 2>, scalar_prefetch = 0 : i64, scratch_operands = 0 : i64, tpu.core_type = #tpu.core_type<tc>, window_params = [{transform_indices = @transform_0, window_bounds = array<i64: 256, 512>}, {pipeline_mode = #tpu.pipeline_mode<synchronous>, transform_indices = @transform_1, window_bounds = array<i64: 512, 64>}, {pipeline_mode = #tpu.pipeline_mode<synchronous>, transform_indices = @transform_2, window_bounds = array<i64: 1, 64>}, {pipeline_mode = #tpu.pipeline_mode<synchronous>, transform_indices = @transform_3, window_bounds = array<i64: 64, 32>}, {pipeline_mode = #tpu.pipeline_mode<synchronous>, transform_indices = @transform_4, window_bounds = array<i64: 1, 32>}, {pipeline_mode = #tpu.pipeline_mode<synchronous>, transform_indices = @transform_5, window_bounds = array<i64: 1, 32>}, {transform_indices = @transform_6, window_bounds = array<i64: 1, 1>}, {transform_indices = @transform_7, window_bounds = array<i64: 256, 128>}]} {
    %c0 = arith.constant 0 : index
    %c0_0 = arith.constant 0 : index
    %0 = vector.load %arg1[%c0, %c0_0] : memref<256x512xf32, #tpu.memory_space<vmem>>, vector<256x512xf32>
    %1 = arith.truncf %0 : vector<256x512xf32> to vector<256x512xbf16>
    %c0_1 = arith.constant 0 : index
    %c0_2 = arith.constant 0 : index
    %2 = vector.load %arg2[%c0_1, %c0_2] : memref<512x64xbf16, #tpu.memory_space<vmem>>, vector<512x64xbf16>
    %cst = arith.constant dense<0.000000e+00> : vector<256x64xf32>
    %3 = tpu.matmul %1, %2, %cst {dimension_numbers = #tpu.dot_dimension_numbers<[1], [0], [0], [1], [0, 0, 1, 1], [], []>} : vector<256x512xbf16>, vector<512x64xbf16>, vector<256x64xf32> -> vector<256x64xf32>
    %c0_3 = arith.constant 0 : index
    %c0_4 = arith.constant 0 : index
    %4 = vector.load %arg3[%c0_3, %c0_4] : memref<1x64xf32, #tpu.memory_space<vmem>>, vector<1x64xf32>
    %5 = vector.broadcast %4 : vector<1x64xf32> to vector<256x64xf32>
    %6 = arith.addf %3, %5 : vector<256x64xf32>
    %cst_5 = arith.constant 0.000000e+00 : f32
    %7 = vector.broadcast %cst_5 : f32 to vector<256x64xf32>
    %8 = arith.maximumf %6, %7 : vector<256x64xf32>
    %9 = arith.truncf %8 : vector<256x64xf32> to vector<256x64xbf16>
    %c0_6 = arith.constant 0 : index
    %c0_7 = arith.constant 0 : index
    %10 = vector.load %arg4[%c0_6, %c0_7] : memref<64x32xbf16, #tpu.memory_space<vmem>>, vector<64x32xbf16>
    %cst_8 = arith.constant dense<0.000000e+00> : vector<256x32xf32>
    %11 = tpu.matmul %9, %10, %cst_8 {dimension_numbers = #tpu.dot_dimension_numbers<[1], [0], [0], [1], [0, 0, 1, 1], [], []>} : vector<256x64xbf16>, vector<64x32xbf16>, vector<256x32xf32> -> vector<256x32xf32>
    %c0_9 = arith.constant 0 : index
    %c0_10 = arith.constant 0 : index
    %12 = vector.load %arg5[%c0_9, %c0_10] : memref<1x32xf32, #tpu.memory_space<vmem>>, vector<1x32xf32>
    %13 = vector.broadcast %12 : vector<1x32xf32> to vector<256x32xf32>
    %14 = arith.addf %11, %13 : vector<256x32xf32>
    %cst_11 = arith.constant 0.000000e+00 : f32
    %15 = vector.broadcast %cst_11 : f32 to vector<256x32xf32>
    %16 = arith.maximumf %14, %15 : vector<256x32xf32>
    %c0_12 = arith.constant 0 : index
    %c0_13 = arith.constant 0 : index
    %17 = vector.load %arg6[%c0_12, %c0_13] : memref<1x32xf32, #tpu.memory_space<vmem>>, vector<1x32xf32>
    %18 = vector.broadcast %17 : vector<1x32xf32> to vector<256x32xf32>
    %19 = arith.mulf %16, %18 : vector<256x32xf32>
    %cst_14 = arith.constant dense<0.000000e+00> : vector<256xf32>
    %20 = vector.multi_reduction <add>, %19, %cst_14 [1] : vector<256x32xf32> to vector<256xf32>
    %21 = vector.shape_cast %20 : vector<256xf32> to vector<256x1xf32>
    %c0_15 = arith.constant 0 : index
    %c0_16 = arith.constant 0 : index
    %22 = memref.load %arg7[%c0_15, %c0_16] : memref<1x1xf32, #tpu.memory_space<smem>>
    %23 = vector.broadcast %22 : f32 to vector<256x1xf32>
    %24 = arith.addf %21, %23 : vector<256x1xf32>
    %cst_17 = arith.constant 0.000000e+00 : f32
    %25 = vector.broadcast %cst_17 : f32 to vector<256x1xf32>
    %26 = arith.subf %25, %24 : vector<256x1xf32>
    %27 = math.exp %26 : vector<256x1xf32>
    %cst_18 = arith.constant 1.000000e+00 : f32
    %28 = vector.broadcast %cst_18 : f32 to vector<256x1xf32>
    %29 = arith.addf %28, %27 : vector<256x1xf32>
    %30 = tpu.reciprocal %29 {approx = true} : vector<256x1xf32> -> vector<256x1xf32>
    %31 = vector.shape_cast %30 : vector<256x1xf32> to vector<256x1xf32>
    %32 = vector.broadcast %31 : vector<256x1xf32> to vector<256x128xf32>
    %c0_19 = arith.constant 0 : index
    %c0_20 = arith.constant 0 : index
    %33 = vector.load %arg8[%c0_19, %c0_20] : memref<256x128xf32, #tpu.memory_space<vmem>>, vector<256x128xf32>
    tpu.vector_store %arg8[%c0_19, %c0_20], %32 {strides = array<i32>} : memref<256x128xf32, #tpu.memory_space<vmem>>, vector<256x128xf32>,
    return
  }
  func.func @transform_0(%arg0: i32) -> (i32, i32) {
    %c0_i32 = arith.constant 0 : i32
    %c0_i32_0 = arith.constant 0 : i32
    return %arg0, %c0_i32 : i32, i32
  }
  func.func @transform_1(%arg0: i32) -> (i32, i32) {
    %c0_i32 = arith.constant 0 : i32
    %c0_i32_0 = arith.constant 0 : i32
    %c0_i32_1 = arith.constant 0 : i32
    return %c0_i32, %c0_i32_0 : i32, i32
  }
  func.func @transform_2(%arg0: i32) -> (i32, i32) {
    %c0_i32 = arith.constant 0 : i32
    %c0_i32_0 = arith.constant 0 : i32
    %c0_i32_1 = arith.constant 0 : i32
    return %c0_i32, %c0_i32_0 : i32, i32
  }
  func.func @transform_3(%arg0: i32) -> (i32, i32) {
    %c0_i32 = arith.constant 0 : i32
    %c0_i32_0 = arith.constant 0 : i32
    %c0_i32_1 = arith.constant 0 : i32
    return %c0_i32, %c0_i32_0 : i32, i32
  }
  func.func @transform_4(%arg0: i32) -> (i32, i32) {
    %c0_i32 = arith.constant 0 : i32
    %c0_i32_0 = arith.constant 0 : i32
    %c0_i32_1 = arith.constant 0 : i32
    return %c0_i32, %c0_i32_0 : i32, i32
  }
  func.func @transform_5(%arg0: i32) -> (i32, i32) {
    %c0_i32 = arith.constant 0 : i32
    %c0_i32_0 = arith.constant 0 : i32
    %c0_i32_1 = arith.constant 0 : i32
    return %c0_i32, %c0_i32_0 : i32, i32
  }
  func.func @transform_6(%arg0: i32) -> (i32, i32) {
    %c0_i32 = arith.constant 0 : i32
    %c0_i32_0 = arith.constant 0 : i32
    %c0_i32_1 = arith.constant 0 : i32
    return %c0_i32, %c0_i32_0 : i32, i32
  }
  func.func @transform_7(%arg0: i32) -> (i32, i32) {
    %c0_i32 = arith.constant 0 : i32
    %c0_i32_0 = arith.constant 0 : i32
    return %arg0, %c0_i32 : i32, i32
  }
}

</mosaic_0001>

<bundles_post_ra>
// kernel: tpu_custom_call.1
= control target key start
LH: loop header
LB: loop body
LE: loop exit
PB: predicated region body
PF: predicated region fallthrough
CT: control target
= control target key end

     0   :  { %s3244_s0 = inlined_call_operand.hbm [shape: f32[512,512], index: 0, kind: input, shape index: {}]   ;;  %s3245_s1 = inlined_call_operand.vmem [shape: bf16[512,64], index: 1, kind: input, shape index: {}]   ;;  %s3246_s2 = inlined_call_operand.vmem [shape: f32[1,64], index: 2, kind: input, shape index: {}]   ;;  %s3247_s3 = inlined_call_operand.vmem [shape: bf16[64,32], index: 3, kind: input, shape index: {}]   ;;  %s3248_s4 = inlined_call_operand.vmem [shape: f32[1,32], index: 4, kind: input, shape index: {}]   ;;  %s3249_s5 = inlined_call_operand.vmem [shape: f32[1,32], index: 5, kind: input, shape index: {}]   ;;  %s3250_s6 = inlined_call_operand.<no memory space> [shape: f32[1,1], index: 6, kind: input, shape index: {}]   ;;  %s3251_s7 = inlined_call_operand.hbm [shape: f32[512,128], index: 7, kind: output, shape index: {}]  }
   0x1   :  { %12 = sst [smem:[#allocation2]] %s3250_s6 }
   0x2   :  { %13 = vsyncpa [#allocation4], 0 }
   0x3   :  { %15 = vsyncpa [#allocation4 + $0x1], 0 }
   0x4   :  { %16 = vsyncpa [#allocation5], 0 }
   0x5   :  { %18 = vsyncpa [#allocation5 + $0x1], 0  ;;  %s2591_s26 = smov 0   ;;  %s2593_s27 = smov 0  }
   0x6   :  { %s2595_s28 = smov 0   ;;  %s2597_s29 = smov 0  }
   0x7 LB: > { %s2612_s6 = sadd.s32 4294967295, %s2540_s29   ;;  %s1857_s30 = sadd.s32 4294967294, %s2540_s29   ;;  %s2540_s29 = sphi %s2597_s29, %s3264_s29   ;;  %s2536_s28 = sphi %s2595_s28, %s3263_s28   ;;  %s2532_s27 = sphi %s2593_s27, %s3262_s27   ;;  %s2528_s26 = sphi %s2591_s26, %s3261_s26  }
   0x8   : > { %s2616_s8 = sadd.s32 1, %s2540_s29   ;;  %s31_s9 = sadd.s32 1, %s2536_s28 }
   0x9   : > { %s28_s10 = ssub.s32 %s2540_s29, %s2616_s8  ;;  %p38_p0 = scmp.ne.s32.totalorder %s2536_s28, %s2532_s27 }
   0xa   : > { %p29_p1 = scmp.eq.s32.totalorder %s28_s10, 0  ;;  %p39_p2 = scmp.eq.s32.totalorder %s2540_s29, 0 }
   0xb   : > { %p44_p3 = scmp.ne.s32.totalorder %s2532_s27, %s2528_s26  ;;  %p45_p4 = scmp.eq.s32.totalorder %s2612_s6, 0 }
   0xc   : > { %s2628_s11 = scalar_select %p29_p1, %s2536_s28, %s31_s9  }
   0xd   : > { %p2630_p5 = por %p39_p2, %p38_p0  ;;  %p2634_p6 = por %p45_p4, %p44_p3 }
   0xe   : > { %p194_p7 = scmp.eq.s32.totalorder %s2612_s6, 1  ;;  %p200_p8 = scmp.eq.s32.totalorder %s1857_s30, 1 }
   0xf   : > { %p2242_p10 = scmp.lt.s32.totalorder %s2540_s29, 2  ;;  %s238_s16 = sand.u32 1, %s2536_s28  }
  0x10   : > { %p2641_p11 = por %p194_p7, %p38_p0  ;;  %p2645_p12 = por %p200_p8, %p44_p3 }
  0x11   : > { %s1928_s17 = sshll.u32 %s2540_s29, 14  ;;  %s1860_s18 = sshll.u32 %s238_s16, 10 }
  0x12   : > { %s3255_s14 = scalar_select %p2641_p11, 1, 0 }
  0x13   : > { %s3256_s15 = scalar_select %p2645_p12, 1, 0 }
  0x14   : > { %s2654_s21 = scalar_lea.hbm %s3244_s0, %s1928_s17  ;;  %s242_s22 = scalar_lea.vmem [#allocation3], %s1860_s18 }
  0x15   : > { %s250_s23 = sshll.u32 %s242_s22, 4  ;;  %p2658_p13 = pnand %p2242_p10, %p2630_p5  ;;  %s2662_s23 = int_to_ptr.vmem [resolvable:$true] %s250_s23 }
  0x16   : > { %s2664_s25 = scalar_lea.sflag [#allocation4], %s238_s16  ;;  %s2444_s30 = scalar_lea.hbm %s2654_s21, 16384 }
  0x17   : > { %p2445_p0 = scmp.ne.s32.totalorder %s2654_s21, %s2444_s30  ;;  %p2446_p1 = pneg %p2658_p13 }
  0x18   : > { %s2449_s12 = scalar_lea.hbm %s3244_s0, 32768  ;;  %p2450_p4 = scmp.lt.u32.totalorder %s2654_s21, %s3244_s0 }
  0x19   : > { %p2447_p2 = pnand %p2446_p1, %p2445_p0  ;;  %p2451_p5 = scmp.lt.u32.totalorder %s2449_s12, %s2444_s30 }
  0x1a   : > { %p2453_p8 = scmp.lt.u32.totalorder %s2444_s30, %s2654_s21 }
  0x1b   : > { %p2448_p3 = pneg %p2447_p2  ;;  %p2452_p7 = por %p2451_p5, %p2450_p4 }
  0x1d   : > { %p2454_p10 = por %p2453_p8, %p2452_p7 }
  0x1f   : > { %p2455_p9 = pnand %p2454_p10, %p2448_p3 }
  0x21   : > { %2458 = shalt.err (!%p2455_p9)
}
  0x22   : > { %s2459_s16 = scalar_lea.vmem %s2662_s23, 16384  ;;  %s2542_s19 = smov [#allocation3]  }
  0x23   : > { %p2460_p0 = scmp.ne.s32.totalorder %s2662_s23, %s2459_s16  ;;  %s2464_s20 = sshll.u32 %s2542_s19, 4  ;;  %s2465_s20 = int_to_ptr.vmem [resolvable:$false] %s2464_s20 }
  0x24   : > { %s2466_s22 = scalar_lea.vmem %s2465_s20, 32768  ;;  %p2467_p11 = scmp.lt.s32.totalorder %s2662_s23, %s2465_s20 }
  0x25   : > { %p2462_p2 = pnand %p2460_p0, %p2446_p1  ;;  %p2468_p4 = scmp.lt.s32.totalorder %s2466_s22, %s2459_s16 }
  0x27   : > { %p2463_p12 = pneg %p2462_p2  ;;  %p2469_p5 = por %p2468_p4, %p2467_p11 }
  0x29   : > { %p2470_p7 = pnand %p2469_p5, %p2463_p12 }
  0x2b   : > { %2473 = shalt.err (!%p2470_p7)
}
  0x2c   : > { %s2543_s30 = smov 512   ;;  %s2544_s9 = smov 32  }
  0x2d   : > { %2237 = dma.hbm_to_vmem [thread:$0]  (!%p2658_p13), %s2654_s21, 16384, %s2662_s23, %s2664_s25, %s2543_s30, %s2543_s30, %s2544_s9  }
  0x2e   : > { %p1864_p9 = scmp.ge.s32.totalorder %s2540_s29, 1  ;;  %p258_p1 = scmp.lt.s32.totalorder %s2540_s29, 3 }
  0x30   : > { %p259_p3 = pnand %p1864_p9, %p258_p1 }
  0x31   : > { %s2695_s10 = sand.u32 (!%p259_p3), 1, %s2532_s27  }
  0x32   : > { %262 = sbr.rel (%p259_p3) target bundleno = 880 (0x370), region = 48  ;;  %s1865_s12 = sshll.u32 (!%p259_p3), %s2695_s10, 10 }
  0x33   : > { %s265_s17 = scalar_lea.sflag (!%p259_p3), [#allocation4], %s2695_s10  ;;  %s2699_s18 = scalar_lea.vmem (!%p259_p3), [#allocation3], %s1865_s12 }
  0x39   : > { %2519 = dma.done.wait (%p2634_p6), %s265_s17, 16384  }
  0x3a   : > { %2521 = vsyncadd (%p2634_p6), %s265_s17, 4294950912  ;;  %v2280_v0 = vld [vmem:[%s3245_s1 + $0x40] sm:$0xff]   ;;  %v2282_v2 = vld [vmem:[%s3245_s1 + $0x48] sm:$0xff]   ;;  %vm1166_vm0 = vcmask 523264   ;;  %vm1447_vm1 = vcmask 261120   ;;  %s1544_s17 = sld [smem:[#allocation2]] }
  0x3b   : > { %v2281_v1 = vld [vmem:[%s3245_s1] sm:$0xff]   ;;  %2214 = vmatprep.subr.bf16.mxu1 %v2280_v0  ;;  %1930 = vmatprep.subr.bf16.mxu0 %v2280_v0  ;;  %v2283_v3 = vld [vmem:[%s3245_s1 + $0x8] sm:$0xff]   ;;  %v2284_v4 = vld [vmem:[%s3245_s1 + $0x50] sm:$0xff]   ;;  %s1866_s21 = sshll.u32 %s2695_s10, 8  ;;  %s1929_s24 = sshll.u32 %s2612_s6, 12 }
  0x3c   : > { %2222 = vmatpush3.bf16.msra.mxu1 %v2281_v1  ;;  %1931 = vmatpush3.bf16.msra.mxu0 %v2281_v1  ;;  %v2285_v5 = vld [vmem:[%s3245_s1 + $0x10] sm:$0xff]   ;;  %v2286_v6 = vld [vmem:[%s3245_s1 + $0x58] sm:$0xff]   ;;  %v2288_v8 = vld [vmem:[%s3245_s1 + $0x60] sm:$0xff]   ;;  %s3135_s23 = scalar_lea.vmem [#allocation6], %s1866_s21  ;;  %s3197_s20 = scalar_lea.hbm %s3251_s7, %s1929_s24 }
  0x3d   : > { %2215 = vmatprep.subr.bf16.mxu1 %v2282_v2  ;;  %1932 = vmatprep.subr.bf16.mxu0 %v2282_v2  ;;  %v2287_v7 = vld [vmem:[%s3245_s1 + $0x18] sm:$0xff]   ;;  %v2289_v9 = vld [vmem:[%s3245_s1 + $0x20] sm:$0xff]   ;;  %v2290_v10 = vld [vmem:[%s3245_s1 + $0x68] sm:$0xff]   ;;  %s1784_s25 = sshll.u32 %s3135_s23, 4  ;;  %p3258_p11 = scmp.ne.s32.totalorder %s3255_s14, 0  ;;  %s3199_s25 = int_to_ptr.vmem [resolvable:$true] %s1784_s25 }
  0x3e   : > { %v399_v11 = vld [vmem:[%s2699_s18 + $0x308] sm:$0xff]  ;;  %v2292_v15 = vld [vmem:[%s3245_s1 + $0x70] sm:$0xff]   ;;  %v2294_v17 = vld [vmem:[%s3245_s1 + $0x78] sm:$0xff]   ;;  %s2474_s22 = scalar_lea.vmem %s3199_s25, 4096  ;;  %s2545_s6 = smov [#allocation6]  }
  0x3f   : > { %v403_v12 = vld [vmem:[%s2699_s18 + $0x328] sm:$0xff]  ;;  %v2293_v16 = vld [vmem:[%s3245_s1 + $0x30] sm:$0xff]   ;;  %v2295_v18 = vld [vmem:[%s3245_s1 + $0x38] sm:$0xff]   ;;  %p2475_p6 = scmp.ne.s32.totalorder %s3199_s25, %s2474_s22  ;;  %s2478_s13 = sshll.u32 %s2545_s6, 4  ;;  %s2479_s13 = int_to_ptr.vmem [resolvable:$false] %s2478_s13 }
  0x40   : > { %2223 = vmatpush3.bf16.msra.mxu1 %v2283_v3  ;;  %1933 = vmatpush3.bf16.msra.mxu0 %v2283_v3  ;;  %v479_v13 = vpack.c.bf16 %v403_v12, %v399_v11  ;;  %v2291_v14 = vld [vmem:[%s3245_s1 + $0x28] sm:$0xff]   ;;  %v398_v19 = vld [vmem:[%s2699_s18 + $0x300] sm:$0xff]  ;;  %v2300_v31 = vld [vmem:[%s3245_s1 + $0xd0] sm:$0xff]   ;;  %s2480_s30 = scalar_lea.vmem %s2479_s13, 8192  ;;  %p2481_p8 = scmp.lt.s32.totalorder %s3199_s25, %s2479_s13 }
  0x41   : > { %2216 = vmatprep.subr.bf16.mxu1 %v2284_v4  ;;  %1934 = vmatprep.subr.bf16.mxu0 %v2284_v4  ;;  %v402_v20 = vld [vmem:[%s2699_s18 + $0x320] sm:$0xff]  ;;  %v407_v22 = vld [vmem:[%s2699_s18 + $0x348] sm:$0xff]  ;;  %v2301_v40 = vld [vmem:[%s3245_s1 + $0x90] sm:$0xff]   ;;  %p2476_p12 = pnand %p2475_p6, %p3258_p11  ;;  %p2482_p10 = scmp.lt.s32.totalorder %s2480_s30, %s2474_s22 }
  0x42   : > { %885 = vmatprep.mubr.bf16.mxu1 %v479_v13  ;;  %v2296_v21 = vld [vmem:[%s3245_s1 + $0xc0] sm:$0xff]   ;;  %v411_v23 = vld [vmem:[%s2699_s18 + $0x368] sm:$0xff]  ;;  %v478_v24 = vpack.c.bf16 %v402_v20, %v398_v19  ;;  %v2302_v43 = vld [vmem:[%s3245_s1 + $0xd8] sm:$0xff]  }
  0x43   : > { %v2297_v25 = vld [vmem:[%s3245_s1 + $0x80] sm:$0xff]   ;;  %v483_v26 = vpack.c.bf16 %v411_v23, %v407_v22  ;;  %v2298_v27 = vld [vmem:[%s3245_s1 + $0xc8] sm:$0xff]   ;;  %v2303_v46 = vld [vmem:[%s3245_s1 + $0x98] sm:$0xff]   ;;  %p2477_p13 = pneg %p2476_p12  ;;  %p2483_p0 = por %p2482_p10, %p2481_p8 }
  0x44   : > { %2224 = vmatpush3.bf16.msra.mxu1 %v2285_v5  ;;  %1935 = vmatpush3.bf16.msra.mxu0 %v2285_v5  ;;  %v2299_v28 = vld [vmem:[%s3245_s1 + $0x88] sm:$0xff]   ;;  %v406_v29 = vld [vmem:[%s2699_s18 + $0x340] sm:$0xff]  ;;  %v2309_v12 = vld [vmem:[%s3245_s1 + $0xb0] sm:$0xff]  }
  0x45   : > { %2217 = vmatprep.subr.bf16.mxu1 %v2286_v6  ;;  %1936 = vmatprep.subr.bf16.mxu0 %v2286_v6  ;;  %v410_v30 = vld [vmem:[%s2699_s18 + $0x360] sm:$0xff]  ;;  %v415_v32 = vld [vmem:[%s2699_s18 + $0x388] sm:$0xff]  ;;  %v2308_v6 = vld [vmem:[%s3245_s1 + $0xf0] sm:$0xff]   ;;  %p2484_p2 = pnand %p2483_p0, %p2477_p13 }
  0x46   : > { %v419_v33 = vld [vmem:[%s2699_s18 + $0x3a8] sm:$0xff]  ;;  %v482_v37 = vpack.c.bf16 %v410_v30, %v406_v29  ;;  %v302_v38 = vld [vmem:[%s2699_s18] sm:$0xff]  ;;  %v308_v19 = vld [vmem:[%s2699_s18 + $0x30] sm:$0xff] }
  0x47   : > { %v303_v34 = vld [vmem:[%s2699_s18 + $0x8] sm:$0xff]  ;;  %v306_v39 = vld [vmem:[%s2699_s18 + $0x20] sm:$0xff]  ;;  %v487_v41 = vpack.c.bf16 %v419_v33, %v415_v32  ;;  %v313_v22 = vld [vmem:[%s2699_s18 + $0x58] sm:$0xff] }
  0x48   : > { %2225 = vmatpush3.bf16.msra.mxu1 %v2287_v7  ;;  %1937 = vmatpush3.bf16.msra.mxu0 %v2287_v7  ;;  %v307_v35 = vld [vmem:[%s2699_s18 + $0x28] sm:$0xff]  ;;  %v430_v42 = vpack.c.bf16 %v306_v39, %v302_v38  ;;  %v414_v48 = vld [vmem:[%s2699_s18 + $0x380] sm:$0xff]  ;;  %v305_v7 = vld [vmem:[%s2699_s18 + $0x18] sm:$0xff] }
  0x49   : > { %2218 = vmatprep.subr.bf16.mxu1 %v2288_v8  ;;  %1938 = vmatprep.subr.bf16.mxu0 %v2288_v8  ;;  %v431_v36 = vpack.c.bf16 %v307_v35, %v303_v34  ;;  %v311_v44 = vld [vmem:[%s2699_s18 + $0x48] sm:$0xff]  ;;  %v310_v49 = vld [vmem:[%s2699_s18 + $0x40] sm:$0xff]  ;;  %v309_v8 = vld [vmem:[%s2699_s18 + $0x38] sm:$0xff] }
  0x4a   : > { %v315_v45 = vld [vmem:[%s2699_s18 + $0x68] sm:$0xff]  ;;  %v314_v50 = vld [vmem:[%s2699_s18 + $0x60] sm:$0xff]  ;;  %v433_v13 = vpack.c.bf16 %v309_v8, %v305_v7  ;;  %v317_v23 = vld [vmem:[%s2699_s18 + $0x78] sm:$0xff] }
  0x4b   : > { %789 = vmatprep.mubr.bf16.mxu0 %v431_v36  ;;  %v435_v47 = vpack.c.bf16 %v315_v45, %v311_v44  ;;  %v418_v51 = vld [vmem:[%s2699_s18 + $0x3a0] sm:$0xff]  ;;  %v319_v52 = vld [vmem:[%s2699_s18 + $0x88] sm:$0xff]  ;;  %v434_v57 = vpack.c.bf16 %v314_v50, %v310_v49  ;;  %v321_v34 = vld [vmem:[%s2699_s18 + $0x98] sm:$0xff] }
  0x4c   : > { %2226 = vmatpush3.bf16.msra.mxu1 %v2289_v9  ;;  %1939 = vmatpush3.bf16.msra.mxu0 %v2289_v9  ;;  %v323_v53 = vld [vmem:[%s2699_s18 + $0xa8] sm:$0xff]  ;;  %v2304_v54 = vld [vmem:[%s3245_s1 + $0xe0] sm:$0xff]   ;;  %v486_v58 = vpack.c.bf16 %v418_v51, %v414_v48  ;;  %v325_v35 = vld [vmem:[%s2699_s18 + $0xb8] sm:$0xff] }
  0x4d   : > { %2219 = vmatprep.subr.bf16.mxu1 %v2290_v10  ;;  %1940 = vmatprep.subr.bf16.mxu0 %v2290_v10  ;;  %v423_v55 = vld [vmem:[%s2699_s18 + $0x3c8] sm:$0xff]  ;;  %v439_v59 = vpack.c.bf16 %v323_v53, %v319_v52  ;;  %v2305_v60 = vld [vmem:[%s3245_s1 + $0xa0] sm:$0xff]   ;;  %v441_v39 = vpack.c.bf16 %v325_v35, %v321_v34  ;;  %v329_v44 = vld [vmem:[%s2699_s18 + $0xd8] sm:$0xff] }
  0x4e   : > { %v427_v56 = vld [vmem:[%s2699_s18 + $0x3e8] sm:$0xff]  ;;  %v422_v0 = vld [vmem:[%s2699_s18 + $0x3c0] sm:$0xff]  ;;  %v333_v45 = vld [vmem:[%s2699_s18 + $0xf8] sm:$0xff] }
  0x4f   : > { %v491_v61 = vpack.c.bf16 %v427_v56, %v423_v55  ;;  %v2306_v62 = vld [vmem:[%s3245_s1 + $0xe8] sm:$0xff]   ;;  %v318_v1 = vld [vmem:[%s2699_s18 + $0x80] sm:$0xff]  ;;  %v445_v51 = vpack.c.bf16 %v333_v45, %v329_v44  ;;  %v328_v52 = vld [vmem:[%s2699_s18 + $0xd0] sm:$0xff] }
  0x50   : > { %2227 = vmatpush3.bf16.msra.mxu1 %v2291_v14  ;;  %1941 = vmatpush3.bf16.msra.mxu0 %v2291_v14  ;;  %v2307_v63 = vld [vmem:[%s3245_s1 + $0xa8] sm:$0xff]   ;;  %v322_v2 = vld [vmem:[%s2699_s18 + $0xa0] sm:$0xff]  ;;  %v2310_v14 = vld [vmem:[%s3245_s1 + $0xf8] sm:$0xff]  }
  0x51   : > { %2220 = vmatprep.subr.bf16.mxu1 %v2292_v15  ;;  %1942 = vmatprep.subr.bf16.mxu0 %v2292_v15  ;;  %v426_v3 = vld [vmem:[%s2699_s18 + $0x3e0] sm:$0xff]  ;;  %v327_v4 = vld [vmem:[%s2699_s18 + $0xc8] sm:$0xff]  ;;  %v438_v9 = vpack.c.bf16 %v322_v2, %v318_v1  ;;  %v2311_v15 = vld [vmem:[%s3245_s1 + $0xb8] sm:$0xff]  }
  0x52   : > { %v331_v5 = vld [vmem:[%s2699_s18 + $0xe8] sm:$0xff]  ;;  %v490_v10 = vpack.c.bf16 %v426_v3, %v422_v0  ;;  %v334_v29 = vld [vmem:[%s2699_s18 + $0x100] sm:$0xff]  ;;  %v332_v55 = vld [vmem:[%s2699_s18 + $0xf0] sm:$0xff] }
  0x53   : > { %v443_v11 = vpack.c.bf16 %v331_v5, %v327_v4  ;;  %v335_v20 = vld [vmem:[%s2699_s18 + $0x108] sm:$0xff]  ;;  %v338_v30 = vld [vmem:[%s2699_s18 + $0x120] sm:$0xff]  ;;  %v336_v0 = vld [vmem:[%s2699_s18 + $0x110] sm:$0xff] }
  0x54   : > { %2228 = vmatpush3.bf16.msra.mxu1 %v2293_v16  ;;  %1943 = vmatpush3.bf16.msra.mxu0 %v2293_v16  ;;  %v304_v16 = vld [vmem:[%s2699_s18 + $0x10] sm:$0xff]  ;;  %v343_v32 = vld [vmem:[%s2699_s18 + $0x148] sm:$0xff]  ;;  %v446_v36 = vpack.c.bf16 %v338_v30, %v334_v29  ;;  %v350_v53 = vld [vmem:[%s2699_s18 + $0x180] sm:$0xff] }
  0x55   : > { %2221 = vmatprep.subr.bf16.mxu1 %v2294_v17  ;;  %1944 = vmatprep.subr.bf16.mxu0 %v2294_v17  ;;  %v326_v17 = vld [vmem:[%s2699_s18 + $0xc0] sm:$0xff]  ;;  %v347_v33 = vld [vmem:[%s2699_s18 + $0x168] sm:$0xff]  ;;  %v340_v3 = vld [vmem:[%s2699_s18 + $0x130] sm:$0xff] }
  0x56   : > { %v451_v38 = vpack.c.bf16 %v347_v33, %v343_v32  ;;  %v359_v56 = vld [vmem:[%s2699_s18 + $0x1c8] sm:$0xff]  ;;  %v358_v1 = vld [vmem:[%s2699_s18 + $0x1c0] sm:$0xff]  ;;  %v349_v7 = vld [vmem:[%s2699_s18 + $0x178] sm:$0xff] }
  0x57   : > { %v362_v2 = vld [vmem:[%s2699_s18 + $0x1e0] sm:$0xff]  ;;  %v367_v4 = vld [vmem:[%s2699_s18 + $0x208] sm:$0xff]  ;;  %v361_v30 = vld [vmem:[%s2699_s18 + $0x1d8] sm:$0xff] }
  0x58   : > { %2229 = vmatpush3.bf16.msra.mxu1 %v2295_v18  ;;  %1945 = vmatpush3.bf16.msra.mxu0 %v2295_v18  ;;  %v330_v18 = vld [vmem:[%s2699_s18 + $0xe0] sm:$0xff]  ;;  %v371_v5 = vld [vmem:[%s2699_s18 + $0x228] sm:$0xff]  ;;  %v458_v8 = vpack.c.bf16 %v362_v2, %v358_v1  ;;  %v388_v1 = vld [vmem:[%s2699_s18 + $0x2b0] sm:$0xff] }
  0x59   : > { %2042 = vmatprep.subr.bf16.mxu1 %v2296_v21  ;;  %v339_v21 = vld [vmem:[%s2699_s18 + $0x128] sm:$0xff]  ;;  %v393_v2 = vld [vmem:[%s2699_s18 + $0x2d8] sm:$0xff] }
  0x5a   : > { %v387_v29 = vld [vmem:[%s2699_s18 + $0x2a8] sm:$0xff] }
  0x5b   : > { %886 = vmatmul.mubr.bf16.vlgmr.msra.gmra.mrb[0].mxu1 %v478_v24  ;;  %790 = vmatmul.mubr.bf16.vlgmr.msra.gmra.mrb[0].mxu0 %v430_v42  ;;  %v442_v24 = vpack.c.bf16 %v330_v18, %v326_v17  ;;  %v342_v42 = vld [vmem:[%s2699_s18 + $0x140] sm:$0xff]  ;;  %v379_v17 = vld [vmem:[%s2699_s18 + $0x268] sm:$0xff]  ;;  %v353_v18 = vld [vmem:[%s2699_s18 + $0x198] sm:$0xff] }
  0x5c   : > { %2043 = vmatpush3.bf16.msra.mxu1 %v2297_v25  ;;  %893 = vmatprep.mubr.bf16.mxu1 %v483_v26  ;;  %v432_v25 = vpack.c.bf16 %v308_v19, %v304_v16  ;;  %v447_v26 = vpack.c.bf16 %v339_v21, %v335_v20  ;;  %v375_v16 = vld [vmem:[%s2699_s18 + $0x248] sm:$0xff]  ;;  %v357_v19 = vld [vmem:[%s2699_s18 + $0x1b8] sm:$0xff] }
  0x5d   : > { %2044 = vmatprep.subr.bf16.mxu1 %v2298_v27  ;;  %797 = vmatprep.mubr.bf16.mxu0 %v435_v47  ;;  %v437_v27 = vpack.c.bf16 %v317_v23, %v313_v22  ;;  %v355_v47 = vld [vmem:[%s2699_s18 + $0x1a8] sm:$0xff]  ;;  %v467_v22 = vpack.c.bf16 %v379_v17, %v375_v16  ;;  %v457_v23 = vpack.c.bf16 %v357_v19, %v353_v18  ;;  %v413_v16 = vld [vmem:[%s2699_s18 + $0x378] sm:$0xff]  ;;  %v2314_v19 = vld [vmem:[%s3247_s3 + $0x10] sm:$0xff]  }
  0x60   : > { %2045 = vmatpush3.bf16.msra.mxu1 %v2299_v28  ;;  %v312_v28 = vld [vmem:[%s2699_s18 + $0x50] sm:$0xff] }
  0x61   : > { %2046 = vmatprep.subr.bf16.mxu1 %v2300_v31  ;;  %v316_v31 = vld [vmem:[%s2699_s18 + $0x70] sm:$0xff] }
  0x63   : > { %894 = vmatmul.mubr.bf16.gmra.mrb[4].mxu1 %v482_v37  ;;  %798 = vmatmul.mubr.bf16.gmra.mrb[4].mxu0 %v434_v57  ;;  %v436_v37 = vpack.c.bf16 %v316_v31, %v312_v28  ;;  %v363_v57 = vld [vmem:[%s2699_s18 + $0x1e8] sm:$0xff]  ;;  %v365_v31 = vld [vmem:[%s2699_s18 + $0x1f8] sm:$0xff] }
  0x64   : > { %2047 = vmatpush3.bf16.msra.mxu1 %v2301_v40  ;;  %901 = vmatprep.mubr.bf16.mxu1 %v487_v41  ;;  %v320_v40 = vld [vmem:[%s2699_s18 + $0x90] sm:$0xff]  ;;  %v383_v28 = vld [vmem:[%s2699_s18 + $0x288] sm:$0xff]  ;;  %v461_v35 = vpack.c.bf16 %v365_v31, %v361_v30  ;;  %v429_v30 = vld [vmem:[%s2699_s18 + $0x3f8] sm:$0xff] }
  0x65   : > { %2048 = vmatprep.subr.bf16.mxu1 %v2302_v43  ;;  %805 = vmatprep.mubr.bf16.mxu0 %v439_v59  ;;  %v324_v41 = vld [vmem:[%s2699_s18 + $0xb0] sm:$0xff]  ;;  %v346_v43 = vld [vmem:[%s2699_s18 + $0x160] sm:$0xff]  ;;  %v341_v59 = vld [vmem:[%s2699_s18 + $0x138] sm:$0xff]  ;;  %v471_v34 = vpack.c.bf16 %v387_v29, %v383_v28 }
  0x66   : > { %v450_v48 = vpack.c.bf16 %v346_v43, %v342_v42  ;;  %v440_v49 = vpack.c.bf16 %v324_v41, %v320_v40  ;;  %v391_v40 = vld [vmem:[%s2699_s18 + $0x2c8] sm:$0xff]  ;;  %v369_v42 = vld [vmem:[%s2699_s18 + $0x218] sm:$0xff]  ;;  %v420_v28 = vld [vmem:[%s2699_s18 + $0x3b0] sm:$0xff] }
  0x67   : > { %v395_v41 = vld [vmem:[%s2699_s18 + $0x2e8] sm:$0xff]  ;;  %v373_v43 = vld [vmem:[%s2699_s18 + $0x238] sm:$0xff] }
  0x68   : > { %2049 = vmatpush3.bf16.msra.mxu1 %v2303_v46  ;;  %v351_v46 = vld [vmem:[%s2699_s18 + $0x188] sm:$0xff]  ;;  %v425_v29 = vld [vmem:[%s2699_s18 + $0x3d8] sm:$0xff] }
  0x69   : > { %2050 = vmatprep.subr.bf16.mxu1 %v2304_v54  ;;  %v455_v50 = vpack.c.bf16 %v355_v47, %v351_v46  ;;  %v354_v54 = vld [vmem:[%s2699_s18 + $0x1a0] sm:$0xff]  ;;  %v475_v46 = vpack.c.bf16 %v395_v41, %v391_v40  ;;  %v465_v47 = vpack.c.bf16 %v373_v43, %v369_v42 }
  0x6b   : > { %902 = vmatmul.mubr.bf16.gmra.mrb[8].mxu1 %v486_v58  ;;  %806 = vmatmul.mubr.bf16.gmra.mrb[8].mxu0 %v438_v9  ;;  %v337_v58 = vld [vmem:[%s2699_s18 + $0x118] sm:$0xff]  ;;  %v448_v9 = vpack.c.bf16 %v340_v3, %v336_v0  ;;  %v384_v0 = vld [vmem:[%s2699_s18 + $0x290] sm:$0xff] }
  0x6c   : > { %2051 = vmatpush3.bf16.msra.mxu1 %v2305_v60  ;;  %909 = vmatprep.mubr.bf16.mxu1 %v491_v61  ;;  %v454_v60 = vpack.c.bf16 %v354_v54, %v350_v53  ;;  %v444_v61 = vpack.c.bf16 %v332_v55, %v328_v52  ;;  %v377_v52 = vld [vmem:[%s2699_s18 + $0x258] sm:$0xff] }
  0x6d   : > { %2052 = vmatprep.subr.bf16.mxu1 %v2306_v62  ;;  %813 = vmatprep.mubr.bf16.mxu0 %v443_v11  ;;  %v459_v62 = vpack.c.bf16 %v363_v57, %v359_v56  ;;  %v381_v53 = vld [vmem:[%s2699_s18 + $0x278] sm:$0xff]  ;;  %v376_v57 = vld [vmem:[%s2699_s18 + $0x250] sm:$0xff] }
  0x6e   : > { %v469_v56 = vpack.c.bf16 %v381_v53, %v377_v52  ;;  %v397_v3 = vld [vmem:[%s2699_s18 + $0x2f8] sm:$0xff] }
  0x70   : > { %2053 = vmatpush3.bf16.msra.mxu1 %v2307_v63  ;;  %v449_v63 = vpack.c.bf16 %v341_v59, %v337_v58  ;;  %v380_v58 = vld [vmem:[%s2699_s18 + $0x270] sm:$0xff]  ;;  %v2312_v59 = vld [vmem:[%s3247_s3] sm:$0xff]  }
  0x71   : > { %2054 = vmatprep.subr.bf16.mxu1 %v2308_v6  ;;  %v345_v6 = vld [vmem:[%s2699_s18 + $0x158] sm:$0xff]  ;;  %2174 = vmatprep.subr.bf16.mxu0 %v2312_v59 }
  0x72   : > { %v453_v11 = vpack.c.bf16 %v349_v7, %v345_v6  ;;  %2175 = vmatpush3.bf16.msra.mxu0 %v2312_v59  ;;  %v392_v6 = vld [vmem:[%s2699_s18 + $0x2d0] sm:$0xff] }
  0x73   : > { %910 = vmatmul.mubr.bf16.gmra.mrb[12].mxu1 %v490_v10  ;;  %814 = vmatmul.mubr.bf16.gmra.mrb[12].mxu0 %v442_v24  ;;  %v463_v10 = vpack.c.bf16 %v371_v5, %v367_v4  ;;  %v352_v24 = vld [vmem:[%s2699_s18 + $0x190] sm:$0xff]  ;;  %v472_v4 = vpack.c.bf16 %v388_v1, %v384_v0  ;;  %v477_v5 = vpack.c.bf16 %v397_v3, %v393_v2 }
  0x74   : > { %2055 = vmatpush3.bf16.msra.mxu1 %v2309_v12  ;;  %950 = vmatprep.mubr.bf16.mxu1 %v433_v13  ;;  %v344_v12 = vld [vmem:[%s2699_s18 + $0x150] sm:$0xff]  ;;  %v366_v13 = vld [vmem:[%s2699_s18 + $0x200] sm:$0xff] }
  0x75   : > { %2056 = vmatprep.subr.bf16.mxu1 %v2310_v14  ;;  %821 = vmatprep.mubr.bf16.mxu0 %v447_v26  ;;  %v370_v14 = vld [vmem:[%s2699_s18 + $0x220] sm:$0xff]  ;;  %v396_v7 = vld [vmem:[%s2699_s18 + $0x2f0] sm:$0xff] }
  0x76   : > { %v462_v20 = vpack.c.bf16 %v370_v14, %v366_v13  ;;  %v378_v26 = vld [vmem:[%s2699_s18 + $0x260] sm:$0xff]  ;;  %v404_v13 = vld [vmem:[%s2699_s18 + $0x330] sm:$0xff]  ;;  %v2313_v14 = vld [vmem:[%s3247_s3 + $0x8] sm:$0xff]  }
  0x77   : > { %2176 = vmatprep.subr.bf16.mxu0 %v2313_v14 }
  0x78   : > { %2057 = vmatpush3.bf16.msra.mxu1 %v2311_v15  ;;  %v348_v15 = vld [vmem:[%s2699_s18 + $0x170] sm:$0xff]  ;;  %2177 = vmatpush3.bf16.msra.mxu0 %v2313_v14  ;;  %v2960_v14 = vld [vmem:[%s3246_s2] ss:$0 sm:$0xff] }
  0x79   : > { %v452_v21 = vpack.c.bf16 %v348_v15, %v344_v12  ;;  %v400_v12 = vld [vmem:[%s2699_s18 + $0x310] sm:$0xff]  ;;  %v409_v15 = vld [vmem:[%s2699_s18 + $0x358] sm:$0xff]  ;;  %2178 = vmatprep.subr.bf16.mxu0 %v2314_v19 }
  0x7a   : > { %v480_v17 = vpack.c.bf16 %v404_v13, %v400_v12  ;;  %v485_v18 = vpack.c.bf16 %v413_v16, %v409_v15 }
  0x7b   : > { %951 = vmatmul.mubr.bf16.vlgmr.msra.gmra.mrb[16].mxu1 %v432_v25  ;;  %822 = vmatmul.mubr.bf16.gmra.mrb[16].mxu0 %v446_v36  ;;  %v374_v25 = vld [vmem:[%s2699_s18 + $0x240] sm:$0xff]  ;;  %v360_v36 = vld [vmem:[%s2699_s18 + $0x1d0] sm:$0xff] }
  0x7c   : > { %958 = vmatprep.mubr.bf16.mxu1 %v437_v27  ;;  %829 = vmatprep.mubr.bf16.mxu0 %v451_v38  ;;  %v356_v27 = vld [vmem:[%s2699_s18 + $0x1b0] sm:$0xff]  ;;  %v466_v32 = vpack.c.bf16 %v378_v26, %v374_v25  ;;  %v386_v38 = vld [vmem:[%s2699_s18 + $0x2a0] sm:$0xff] }
  0x7d   : > { %v456_v33 = vpack.c.bf16 %v356_v27, %v352_v24  ;;  %2179 = vmatpush3.bf16.msra.mxu0 %v2314_v19  ;;  %v421_v24 = vld [vmem:[%s2699_s18 + $0x3b8] sm:$0xff]  ;;  %v416_v27 = vld [vmem:[%s2699_s18 + $0x390] sm:$0xff] }
  0x7e   : > { %v488_v31 = vpack.c.bf16 %v420_v28, %v416_v27 }
  0x83   : > { %959 = vmatmul.mubr.bf16.gmra.mrb[20].mxu1 %v436_v37  ;;  %830 = vmatmul.mubr.bf16.gmra.mrb[20].mxu0 %v450_v48  ;;  %v382_v37 = vld [vmem:[%s2699_s18 + $0x280] sm:$0xff] }
  0x84   : > { %966 = vmatprep.mubr.bf16.mxu1 %v441_v39  ;;  %837 = vmatprep.mubr.bf16.mxu0 %v455_v50  ;;  %v364_v39 = vld [vmem:[%s2699_s18 + $0x1f0] sm:$0xff]  ;;  %v470_v44 = vpack.c.bf16 %v386_v38, %v382_v37  ;;  %v390_v48 = vld [vmem:[%s2699_s18 + $0x2c0] sm:$0xff] }
  0x85   : > { %v460_v45 = vpack.c.bf16 %v364_v39, %v360_v36  ;;  %v368_v50 = vld [vmem:[%s2699_s18 + $0x210] sm:$0xff] }
  0x8b   : > { %967 = vmatmul.mubr.bf16.gmra.mrb[24].mxu1 %v440_v49  ;;  %838 = vmatmul.mubr.bf16.gmra.mrb[24].mxu0 %v454_v60  ;;  %v394_v49 = vld [vmem:[%s2699_s18 + $0x2e0] sm:$0xff]  ;;  %v385_v60 = vld [vmem:[%s2699_s18 + $0x298] sm:$0xff] }
  0x8c   : > { %974 = vmatprep.mubr.bf16.mxu1 %v445_v51  ;;  %845 = vmatprep.mubr.bf16.mxu0 %v459_v62  ;;  %v372_v51 = vld [vmem:[%s2699_s18 + $0x230] sm:$0xff]  ;;  %v474_v54 = vpack.c.bf16 %v394_v49, %v390_v48  ;;  %v468_v62 = vpack.c.bf16 %v380_v58, %v376_v57 }
  0x8d   : > { %v464_v55 = vpack.c.bf16 %v372_v51, %v368_v50 }
  0x93   : > { %975 = vmatmul.mubr.bf16.gmra.mrb[28].mxu1 %v444_v61  ;;  %846 = vmatmul.mubr.bf16.gmra.mrb[28].mxu0 %v458_v8  ;;  %v389_v61 = vld [vmem:[%s2699_s18 + $0x2b8] sm:$0xff] }
  0x94   : > { %982 = vmatprep.mubr.bf16.mxu1 %v449_v63  ;;  %853 = vmatprep.mubr.bf16.mxu0 %v463_v10  ;;  %v473_v63 = vpack.c.bf16 %v389_v61, %v385_v60  ;;  %v401_v8 = vld [vmem:[%s2699_s18 + $0x318] sm:$0xff]  ;;  %v476_v10 = vpack.c.bf16 %v396_v7, %v392_v6 }
  0x9b   : > { %983 = vmatmul.mubr.bf16.gmra.mrb[32].mxu1 %v448_v9  ;;  %854 = vmatmul.mubr.bf16.gmra.mrb[32].mxu0 %v462_v20  ;;  %v405_v9 = vld [vmem:[%s2699_s18 + $0x338] sm:$0xff]  ;;  %v408_v20 = vld [vmem:[%s2699_s18 + $0x350] sm:$0xff] }
  0x9c   : > { %990 = vmatprep.mubr.bf16.mxu1 %v453_v11  ;;  %861 = vmatprep.mubr.bf16.mxu0 %v467_v22  ;;  %v481_v11 = vpack.c.bf16 %v405_v9, %v401_v8  ;;  %v2315_v22 = vld [vmem:[%s3247_s3 + $0x18] sm:$0xff]  }
  0x9d   : > { %2180 = vmatprep.subr.bf16.mxu0 %v2315_v22 }
  0x9e   : > { %2181 = vmatpush3.bf16.msra.mxu0 %v2315_v22 }
  0xa3   : > { %991 = vmatmul.mubr.bf16.gmra.mrb[36].mxu1 %v452_v21  ;;  %862 = vmatmul.mubr.bf16.gmra.mrb[36].mxu0 %v466_v32  ;;  %v412_v21 = vld [vmem:[%s2699_s18 + $0x370] sm:$0xff]  ;;  %v493_v32 = vpack.c.bf16 %v429_v30, %v425_v29 }
  0xa4   : > { %998 = vmatprep.mubr.bf16.mxu1 %v457_v23  ;;  %869 = vmatprep.mubr.bf16.mxu0 %v471_v34  ;;  %v417_v23 = vld [vmem:[%s2699_s18 + $0x398] sm:$0xff]  ;;  %v484_v25 = vpack.c.bf16 %v412_v21, %v408_v20  ;;  %v428_v34 = vld [vmem:[%s2699_s18 + $0x3f0] sm:$0xff] }
  0xa5   : > { %v489_v26 = vpack.c.bf16 %v421_v24, %v417_v23 }
  0xab   : > { %999 = vmatmul.mubr.bf16.gmra.mrb[40].mxu1 %v456_v33  ;;  %870 = vmatmul.mubr.bf16.gmra.mrb[40].mxu0 %v470_v44  ;;  %v424_v33 = vld [vmem:[%s2699_s18 + $0x3d0] sm:$0xff]  ;;  %s1771_s18 = scalar_lea.sflag [#allocation5], %s2695_s10 }
  0xac   : > { %1006 = vmatprep.mubr.bf16.mxu1 %v461_v35  ;;  %877 = vmatprep.mubr.bf16.mxu0 %v475_v46  ;;  %v492_v35 = vpack.c.bf16 %v428_v34, %v424_v33 }
  0xb3   : > { %1007 = vmatmul.mubr.bf16.gmra.mrb[44].mxu1 %v460_v45  ;;  %878 = vmatmul.mubr.bf16.gmra.mrb[44].mxu0 %v474_v54 }
  0xb4   : > { %1014 = vmatprep.mubr.bf16.mxu1 %v465_v47 }
  0xbb   : > { %1015 = vmatmul.mubr.bf16.gmra.mrb[48].mxu1 %v464_v55 }
  0xbc   : > { %1022 = vmatprep.mubr.bf16.mxu1 %v469_v56 }
  0xc3   : > { %1023 = vmatmul.mubr.bf16.gmra.mrb[52].mxu1 %v468_v62 }
  0xc4   : > { %1030 = vmatprep.mubr.bf16.mxu1 %v473_v63 }
  0xcb   : > { %1031 = vmatmul.mubr.bf16.gmra.mrb[56].mxu1 %v472_v4 }
  0xcc   : > { %1038 = vmatprep.mubr.bf16.mxu1 %v477_v5 }
  0xd3   : > { %1039 = vmatmul.mubr.bf16.gmra.mrb[60].mxu1 %v476_v10 }
  0xd4   : > { %1046 = vmatprep.mubr.bf16.mxu1 %v481_v11 }
  0xdb   : > { %1047 = vmatmul.mubr.bf16.gmra.mrb[64].mxu1 %v480_v17 }
  0xdc   : > { %1054 = vmatprep.mubr.bf16.mxu1 %v485_v18 }
  0xe3   : > { %1055 = vmatmul.mubr.bf16.gmra.mrb[68].mxu1 %v484_v25 }
  0xe4   : > { %1062 = vmatprep.mubr.bf16.mxu1 %v489_v26 }
  0xeb   : > { %1063 = vmatmul.mubr.bf16.gmra.mrb[72].mxu1 %v488_v31 }
  0xec   : > { %1070 = vmatprep.mubr.bf16.mxu1 %v493_v32 }
  0xf3   : > { %1071 = vmatmul.mubr.bf16.gmra.mrb[76].mxu1 %v492_v35 }
 0x12e   : > { %v2018_v36 = vpop.f32.mrb[0].mxu1  ;;  %v1946_v42 = vpop.f32.mrb[0].mxu0 }
 0x12f   : > { %v2019_v37 = vpop.f32.mrb[1].mxu1  ;;  %v1947_v44 = vpop.f32.mrb[1].mxu0 }
 0x130   : > { %v2941_v38 = vadd.f32 %v2019_v37, %v2018_v36  ;;  %v2021_v39 = vpop.f32.mrb[2].mxu1  ;;  %v1948_v46 = vadd.f32 %v1947_v44, %v1946_v42  ;;  %v1949_v47 = vpop.f32.mrb[2].mxu0 }
 0x131   : > { %v2022_v40 = vpop.f32.mrb[3].mxu1  ;;  %v1950_v50 = vpop.f32.mrb[3].mxu0 }
 0x132   : > { %v2943_v41 = vadd.f32 %v2022_v40, %v2021_v39  ;;  %v1951_v52 = vadd.f32 %v1950_v50, %v1949_v47  ;;  %v792_v16 = vadd.f32 %v1948_v46, %v2960_v14 }
 0x134   : > { %v795_v22 = vadd.f32 %v1951_v52, %v2960_v14 }
 0x136   : > { %v2024_v43 = vpop.f32.mrb[4].mxu1  ;;  %v1952_v54 = vpop.f32.mrb[4].mxu0 }
 0x137   : > { %v2025_v45 = vpop.f32.mrb[5].mxu1  ;;  %v1953_v56 = vpop.f32.mrb[5].mxu0 }
 0x138   : > { %v2945_v48 = vadd.f32 %v2025_v45, %v2024_v43  ;;  %v2027_v49 = vpop.f32.mrb[6].mxu1  ;;  %v1954_v58 = vadd.f32 %v1953_v56, %v1952_v54  ;;  %v1955_v59 = vpop.f32.mrb[6].mxu0 }
 0x139   : > { %v2028_v51 = vpop.f32.mrb[7].mxu1  ;;  %v1956_v62 = vpop.f32.mrb[7].mxu0 }
 0x13a   : > { %v2947_v53 = vadd.f32 %v2028_v51, %v2027_v49  ;;  %v1957_v0 = vadd.f32 %v1956_v62, %v1955_v59  ;;  %v800_v34 = vadd.f32 %v1954_v58, %v2960_v14 }
 0x13c   : > { %v803_v43 = vadd.f32 %v1957_v0, %v2960_v14 }
 0x13e   : > { %v2030_v55 = vpop.f32.mrb[8].mxu1  ;;  %v1958_v2 = vpop.f32.mrb[8].mxu0 }
 0x13f   : > { %v2031_v57 = vpop.f32.mrb[9].mxu1  ;;  %v1959_v4 = vpop.f32.mrb[9].mxu0 }
 0x140   : > { %v2949_v60 = vadd.f32 %v2031_v57, %v2030_v55  ;;  %v2033_v61 = vpop.f32.mrb[10].mxu1  ;;  %v1960_v6 = vadd.f32 %v1959_v4, %v1958_v2  ;;  %v1961_v7 = vpop.f32.mrb[10].mxu0 }
 0x141   : > { %v2034_v63 = vpop.f32.mrb[11].mxu1  ;;  %v1962_v10 = vpop.f32.mrb[11].mxu0 }
 0x142   : > { %v2951_v1 = vadd.f32 %v2034_v63, %v2033_v61  ;;  %v1963_v12 = vadd.f32 %v1962_v10, %v1961_v7  ;;  %v808_v57 = vadd.f32 %v1960_v6, %v2960_v14 }
 0x144   : > { %v811_v2 = vadd.f32 %v1963_v12, %v2960_v14 }
 0x146   : > { %v2036_v3 = vpop.f32.mrb[12].mxu1  ;;  %v1964_v15 = vpop.f32.mrb[12].mxu0 }
 0x147   : > { %v2037_v5 = vpop.f32.mrb[13].mxu1  ;;  %v1965_v18 = vpop.f32.mrb[13].mxu0 }
 0x148   : > { %v2953_v8 = vadd.f32 %v2037_v5, %v2036_v3  ;;  %v2039_v9 = vpop.f32.mrb[14].mxu1  ;;  %v1966_v20 = vadd.f32 %v1965_v18, %v1964_v15  ;;  %v1967_v21 = vpop.f32.mrb[14].mxu0 }
 0x149   : > { %v2040_v11 = vpop.f32.mrb[15].mxu1  ;;  %v1968_v25 = vpop.f32.mrb[15].mxu0 }
 0x14a   : > { %v2955_v13 = vadd.f32 %v2040_v11, %v2039_v9  ;;  %v1969_v27 = vadd.f32 %v1968_v25, %v1967_v21  ;;  %v816_v18 = vadd.f32 %v1966_v20, %v2960_v14 }
 0x14c   : > { %v819_v25 = vadd.f32 %v1969_v27, %v2960_v14 }
 0x14e   : > { %v2058_v17 = vpop.f32.mrb[16].mxu1  ;;  %v1970_v31 = vpop.f32.mrb[16].mxu0 }
 0x14f   : > { %v2059_v19 = vpop.f32.mrb[17].mxu1  ;;  %v1971_v36 = vpop.f32.mrb[17].mxu0 }
 0x150   : > { %v2060_v23 = vadd.f32 %v2059_v19, %v2058_v17  ;;  %v2061_v24 = vpop.f32.mrb[18].mxu1  ;;  %v1972_v39 = vadd.f32 %v1971_v36, %v1970_v31  ;;  %v1973_v40 = vpop.f32.mrb[18].mxu0 }
 0x151   : > { %v2062_v26 = vpop.f32.mrb[19].mxu1  ;;  %v1974_v46 = vpop.f32.mrb[19].mxu0 }
 0x152   : > { %v953_v28 = vadd.f32 %v2060_v23, %v792_v16  ;;  %v2063_v29 = vadd.f32 %v2062_v26, %v2061_v24  ;;  %v1975_v49 = vadd.f32 %v1974_v46, %v1973_v40 }
 0x154   : > { %v956_v30 = vadd.f32 %v2063_v29, %v795_v22  ;;  %v1079_v32 = vmax.f32 %v953_v28, 0.0  ;;  %v827_v46 = vadd.f32 %v1975_v49, %v2960_v14 }
 0x156   : > { %v1080_v33 = vmax.f32 %v956_v30, 0.0  ;;  %v2064_v35 = vpop.f32.mrb[20].mxu1  ;;  %v1976_v54 = vpop.f32.mrb[20].mxu0 }
 0x157   : > { %v2065_v37 = vpop.f32.mrb[21].mxu1  ;;  %v1977_v59 = vpop.f32.mrb[21].mxu0 }
 0x158   : > { %v1111_v42 = vpack.c.bf16 %v1080_v33, %v1079_v32  ;;  %v2066_v44 = vadd.f32 %v2065_v37, %v2064_v35  ;;  %v2067_v45 = vpop.f32.mrb[22].mxu1  ;;  %v1978_v62 = vadd.f32 %v1977_v59, %v1976_v54  ;;  %v1979_v63 = vpop.f32.mrb[22].mxu0  ;;  %v824_v37 = vadd.f32 %v1972_v39, %v2960_v14 }
 0x159   : > { %v2068_v47 = vpop.f32.mrb[23].mxu1  ;;  %v1980_v5 = vpop.f32.mrb[23].mxu0 }
 0x15a   : > { %v961_v50 = vadd.f32 %v2066_v44, %v800_v34  ;;  %v2069_v51 = vadd.f32 %v2068_v47, %v2067_v45  ;;  %2182 = vmatprep.mubr.msk.bf16.mxu0 %vm1166_vm0, %v1111_v42  ;;  %v1981_v9 = vadd.f32 %v1980_v5, %v1979_v63 }
 0x15c   : > { %v964_v52 = vadd.f32 %v2069_v51, %v803_v43  ;;  %v1081_v55 = vmax.f32 %v961_v50, 0.0  ;;  %v835_v5 = vadd.f32 %v1981_v9, %v2960_v14 }
 0x15e   : > { %v1082_v56 = vmax.f32 %v964_v52, 0.0  ;;  %v2070_v58 = vpop.f32.mrb[24].mxu1  ;;  %v1982_v16 = vpop.f32.mrb[24].mxu0 }
 0x15f   : > { %v2071_v61 = vpop.f32.mrb[25].mxu1  ;;  %v1983_v21 = vpop.f32.mrb[25].mxu0 }
 0x160   : > { %v1112_v0 = vpack.c.bf16 %v1082_v56, %v1081_v55  ;;  %v2072_v3 = vadd.f32 %v2071_v61, %v2070_v58  ;;  %v2073_v4 = vpop.f32.mrb[26].mxu1  ;;  %v1984_v23 = vadd.f32 %v1983_v21, %v1982_v16  ;;  %v1985_v12 = vpop.f32.mrb[26].mxu0  ;;  %v832_v61 = vadd.f32 %v1978_v62, %v2960_v14 }
 0x161   : > { %v2074_v7 = vpop.f32.mrb[27].mxu1  ;;  %v1986_v29 = vpop.f32.mrb[27].mxu0 }
 0x162   : > { %v969_v10 = vadd.f32 %v2072_v3, %v808_v57  ;;  %v2075_v11 = vadd.f32 %v2074_v7, %v2073_v4  ;;  %2183 = vmatmul.mubr.msk.bf16.vlgmr.msra.gmra.mrb[48].mxu0 %vm1166_vm0, %v1112_v0  ;;  %v1987_v31 = vadd.f32 %v1986_v29, %v1985_v12 }
 0x164   : > { %v972_v15 = vadd.f32 %v2075_v11, %v811_v2  ;;  %v1083_v6 = vmax.f32 %v969_v10, 0.0  ;;  %v843_v29 = vadd.f32 %v1987_v31, %v2960_v14 }
 0x166   : > { %v1084_v17 = vmax.f32 %v972_v15, 0.0  ;;  %v2076_v19 = vpop.f32.mrb[28].mxu1  ;;  %v1988_v35 = vpop.f32.mrb[28].mxu0 }
 0x167   : > { %v2077_v22 = vpop.f32.mrb[29].mxu1  ;;  %v1989_v42 = vpop.f32.mrb[29].mxu0 }
 0x168   : > { %v1113_v24 = vpack.c.bf16 %v1084_v17, %v1083_v6  ;;  %v2078_v26 = vadd.f32 %v2077_v22, %v2076_v19  ;;  %v2079_v28 = vpop.f32.mrb[30].mxu1  ;;  %v1990_v44 = vadd.f32 %v1989_v42, %v1988_v35  ;;  %v1991_v27 = vpop.f32.mrb[30].mxu0  ;;  %v840_v22 = vadd.f32 %v1984_v23, %v2960_v14 }
 0x169   : > { %v2080_v30 = vpop.f32.mrb[31].mxu1  ;;  %v1992_v51 = vpop.f32.mrb[31].mxu0 }
 0x16a   : > { %v977_v32 = vadd.f32 %v2078_v26, %v816_v18  ;;  %v2081_v33 = vadd.f32 %v2080_v30, %v2079_v28  ;;  %2186 = vmatprep.mubr.msk.bf16.mxu0 %vm1166_vm0, %v1113_v24  ;;  %v1993_v54 = vadd.f32 %v1992_v51, %v1991_v27 }
 0x16c   : > { %v980_v34 = vadd.f32 %v2081_v33, %v819_v25  ;;  %v1085_v20 = vmax.f32 %v977_v32, 0.0  ;;  %v851_v51 = vadd.f32 %v1993_v54, %v2960_v14 }
 0x16e   : > { %v1086_v36 = vmax.f32 %v980_v34, 0.0  ;;  %v2082_v40 = vpop.f32.mrb[32].mxu1  ;;  %v1994_v58 = vpop.f32.mrb[32].mxu0 }
 0x16f   : > { %v2083_v43 = vpop.f32.mrb[33].mxu1  ;;  %v1995_v0 = vpop.f32.mrb[33].mxu0 }
 0x170   : > { %v1114_v45 = vpack.c.bf16 %v1086_v36, %v1085_v20  ;;  %v2084_v47 = vadd.f32 %v2083_v43, %v2082_v40  ;;  %v2085_v50 = vpop.f32.mrb[34].mxu1  ;;  %v1996_v3 = vadd.f32 %v1995_v0, %v1994_v58  ;;  %v1997_v49 = vpop.f32.mrb[34].mxu0  ;;  %v848_v43 = vadd.f32 %v1990_v44, %v2960_v14 }
 0x171   : > { %v2086_v52 = vpop.f32.mrb[35].mxu1  ;;  %v1998_v11 = vpop.f32.mrb[35].mxu0 }
 0x172   : > { %v985_v55 = vadd.f32 %v2084_v47, %v824_v37  ;;  %v2087_v56 = vadd.f32 %v2086_v52, %v2085_v50  ;;  %2187 = vmatmul.mubr.msk.bf16.gmra.mrb[52].mxu0 %vm1166_vm0, %v1114_v45  ;;  %v1999_v16 = vadd.f32 %v1998_v11, %v1997_v49 }
 0x174   : > { %v988_v57 = vadd.f32 %v2087_v56, %v827_v46  ;;  %v1087_v39 = vmax.f32 %v985_v55, 0.0  ;;  %v859_v11 = vadd.f32 %v1999_v16, %v2960_v14 }
 0x176   : > { %v1088_v59 = vmax.f32 %v988_v57, 0.0  ;;  %v2088_v63 = vpop.f32.mrb[36].mxu1  ;;  %v2000_v19 = vpop.f32.mrb[36].mxu0 }
 0x177   : > { %v2089_v2 = vpop.f32.mrb[37].mxu1  ;;  %v2001_v24 = vpop.f32.mrb[37].mxu0 }
 0x178   : > { %v1115_v4 = vpack.c.bf16 %v1088_v59, %v1087_v39  ;;  %v2090_v7 = vadd.f32 %v2089_v2, %v2088_v63  ;;  %v2091_v10 = vpop.f32.mrb[38].mxu1  ;;  %v2002_v26 = vadd.f32 %v2001_v24, %v2000_v19  ;;  %v2003_v9 = vpop.f32.mrb[38].mxu0  ;;  %v856_v2 = vadd.f32 %v1996_v3, %v2960_v14 }
 0x179   : > { %v2092_v15 = vpop.f32.mrb[39].mxu1  ;;  %v2004_v33 = vpop.f32.mrb[39].mxu0 }
 0x17a   : > { %v993_v6 = vadd.f32 %v2090_v7, %v832_v61  ;;  %v2093_v17 = vadd.f32 %v2092_v15, %v2091_v10  ;;  %2190 = vmatprep.mubr.msk.bf16.mxu0 %vm1166_vm0, %v1115_v4  ;;  %v2005_v35 = vadd.f32 %v2004_v33, %v2003_v9  ;;  %v864_v24 = vadd.f32 %v2002_v26, %v2960_v14 }
 0x17c   : > { %v996_v18 = vadd.f32 %v2093_v17, %v835_v5  ;;  %v1089_v62 = vmax.f32 %v993_v6, 0.0 }
 0x17e   : > { %v1090_v21 = vmax.f32 %v996_v18, 0.0  ;;  %v2094_v12 = vpop.f32.mrb[40].mxu1  ;;  %v2006_v40 = vpop.f32.mrb[40].mxu0 }
 0x17f   : > { %v2095_v25 = vpop.f32.mrb[41].mxu1  ;;  %v2007_v45 = vpop.f32.mrb[41].mxu0 }
 0x180   : > { %v1116_v28 = vpack.c.bf16 %v1090_v21, %v1089_v62  ;;  %v2096_v30 = vadd.f32 %v2095_v25, %v2094_v12  ;;  %v2097_v32 = vpop.f32.mrb[42].mxu1  ;;  %v2008_v47 = vadd.f32 %v2007_v45, %v2006_v40  ;;  %v2009_v31 = vpop.f32.mrb[42].mxu0 }
 0x181   : > { %v2098_v34 = vpop.f32.mrb[43].mxu1  ;;  %v2010_v56 = vpop.f32.mrb[43].mxu0 }
 0x182   : > { %v1001_v20 = vadd.f32 %v2096_v30, %v840_v22  ;;  %v2099_v36 = vadd.f32 %v2098_v34, %v2097_v32  ;;  %2191 = vmatmul.mubr.msk.bf16.gmra.mrb[56].mxu0 %vm1166_vm0, %v1116_v28  ;;  %v2011_v58 = vadd.f32 %v2010_v56, %v2009_v31  ;;  %v872_v40 = vadd.f32 %v2008_v47, %v2960_v14 }
 0x184   : > { %v1004_v37 = vadd.f32 %v2099_v36, %v843_v29  ;;  %v1091_v23 = vmax.f32 %v1001_v20, 0.0  ;;  %v867_v29 = vadd.f32 %v2005_v35, %v2960_v14 }
 0x186   : > { %v1092_v42 = vmax.f32 %v1004_v37, 0.0  ;;  %v2100_v27 = vpop.f32.mrb[44].mxu1  ;;  %v2012_v63 = vpop.f32.mrb[44].mxu0 }
 0x187   : > { %v2101_v46 = vpop.f32.mrb[45].mxu1  ;;  %v2013_v4 = vpop.f32.mrb[45].mxu0 }
 0x188   : > { %v1117_v50 = vpack.c.bf16 %v1092_v42, %v1091_v23  ;;  %v2102_v52 = vadd.f32 %v2101_v46, %v2100_v27  ;;  %v2103_v55 = vpop.f32.mrb[46].mxu1  ;;  %v2014_v7 = vadd.f32 %v2013_v4, %v2012_v63  ;;  %v2015_v54 = vpop.f32.mrb[46].mxu0 }
 0x189   : > { %v2104_v57 = vpop.f32.mrb[47].mxu1  ;;  %v2016_v17 = vpop.f32.mrb[47].mxu0 }
 0x18a   : > { %v1009_v39 = vadd.f32 %v2102_v52, %v848_v43  ;;  %v2105_v59 = vadd.f32 %v2104_v57, %v2103_v55  ;;  %2194 = vmatprep.mubr.msk.bf16.mxu0 %vm1166_vm0, %v1117_v50  ;;  %v2017_v19 = vadd.f32 %v2016_v17, %v2015_v54  ;;  %v875_v43 = vadd.f32 %v2011_v58, %v2960_v14 }
 0x18b   : > { %v880_v55 = vadd.f32 %v2014_v7, %v2960_v14  ;;  %v888_v7 = vadd.f32 %v2941_v38, %v2960_v14 }
 0x18c   : > { %v1012_v61 = vadd.f32 %v2105_v59, %v851_v51  ;;  %v1093_v44 = vmax.f32 %v1009_v39, 0.0  ;;  %v883_v39 = vadd.f32 %v2017_v19, %v2960_v14 }
 0x18e   : > { %v1094_v0 = vmax.f32 %v1012_v61, 0.0  ;;  %v2106_v49 = vpop.f32.mrb[48].mxu1 }
 0x18f   : > { %v2107_v5 = vpop.f32.mrb[49].mxu1 }
 0x190   : > { %v1118_v10 = vpack.c.bf16 %v1094_v0, %v1093_v44  ;;  %v2108_v15 = vadd.f32 %v2107_v5, %v2106_v49  ;;  %v2109_v6 = vpop.f32.mrb[50].mxu1 }
 0x191   : > { %v2110_v18 = vpop.f32.mrb[51].mxu1 }
 0x192   : > { %v1017_v62 = vadd.f32 %v2108_v15, %v856_v2  ;;  %v2111_v21 = vadd.f32 %v2110_v18, %v2109_v6  ;;  %2195 = vmatmul.mubr.msk.bf16.gmra.mrb[60].mxu0 %vm1166_vm0, %v1118_v10  ;;  %v891_v6 = vadd.f32 %v2943_v41, %v2960_v14 }
 0x194   : > { %v1020_v22 = vadd.f32 %v2111_v21, %v859_v11  ;;  %v1095_v12 = vmax.f32 %v1017_v62, 0.0 }
 0x196   : > { %v1096_v3 = vmax.f32 %v1020_v22, 0.0  ;;  %v2112_v25 = vpop.f32.mrb[52].mxu1 }
 0x197   : > { %v2113_v9 = vpop.f32.mrb[53].mxu1 }
 0x198   : > { %v1119_v28 = vpack.c.bf16 %v1096_v3, %v1095_v12  ;;  %v2114_v16 = vadd.f32 %v2113_v9, %v2112_v25  ;;  %v2115_v30 = vpop.f32.mrb[54].mxu1  ;;  %v896_v3 = vadd.f32 %v2945_v48, %v2960_v14 }
 0x199   : > { %v2116_v32 = vpop.f32.mrb[55].mxu1 }
 0x19a   : > { %v1025_v33 = vadd.f32 %v2114_v16, %v864_v24  ;;  %v2117_v34 = vadd.f32 %v2116_v32, %v2115_v30  ;;  %2198 = vmatprep.mubr.msk.bf16.mxu0 %vm1166_vm0, %v1119_v28  ;;  %v899_v28 = vadd.f32 %v2947_v53, %v2960_v14 }
 0x19c   : > { %v1028_v20 = vadd.f32 %v2117_v34, %v867_v29  ;;  %v1097_v36 = vmax.f32 %v1025_v33, 0.0 }
 0x19e   : > { %v1098_v37 = vmax.f32 %v1028_v20, 0.0  ;;  %v2118_v23 = vpop.f32.mrb[56].mxu1  ;;  %v904_v20 = vadd.f32 %v2949_v60, %v2960_v14 }
 0x19f   : > { %v2119_v42 = vpop.f32.mrb[57].mxu1 }
 0x1a0   : > { %v1120_v26 = vpack.c.bf16 %v1098_v37, %v1097_v36  ;;  %v2120_v27 = vadd.f32 %v2119_v42, %v2118_v23  ;;  %v2121_v45 = vpop.f32.mrb[58].mxu1  ;;  %v907_v23 = vadd.f32 %v2951_v1, %v2960_v14 }
 0x1a1   : > { %v2122_v35 = vpop.f32.mrb[59].mxu1 }
 0x1a2   : > { %v1033_v46 = vadd.f32 %v2120_v27, %v872_v40  ;;  %v2123_v31 = vadd.f32 %v2122_v35, %v2121_v45  ;;  %2199 = vmatmul.mubr.msk.bf16.gmra.mrb[64].mxu0 %vm1166_vm0, %v1120_v26 }
 0x1a4   : > { %v1036_v50 = vadd.f32 %v2123_v31, %v875_v43  ;;  %v1099_v51 = vmax.f32 %v1033_v46, 0.0  ;;  %v912_v46 = vadd.f32 %v2953_v8, %v2960_v14  ;;  %v3021_v8 = vld [vmem:[%s3248_s4] ss:$0 sm:$0xff] }
 0x1a6   : > { %v1100_v52 = vmax.f32 %v1036_v50, 0.0  ;;  %v2124_v56 = vpop.f32.mrb[60].mxu1 }
 0x1a7   : > { %v2125_v57 = vpop.f32.mrb[61].mxu1 }
 0x1a8   : > { %v1121_v47 = vpack.c.bf16 %v1100_v52, %v1099_v51  ;;  %v2126_v59 = vadd.f32 %v2125_v57, %v2124_v56  ;;  %v2127_v61 = vpop.f32.mrb[62].mxu1  ;;  %v915_v52 = vadd.f32 %v2955_v13, %v2960_v14 }
 0x1a9   : > { %v2128_v58 = vpop.f32.mrb[63].mxu1 }
 0x1aa   : > { %v1041_v63 = vadd.f32 %v2126_v59, %v880_v55  ;;  %v2129_v44 = vadd.f32 %v2128_v58, %v2127_v61  ;;  %2202 = vmatprep.mubr.msk.bf16.mxu0 %vm1166_vm0, %v1121_v47 }
 0x1ac   : > { %v1044_v0 = vadd.f32 %v2129_v44, %v883_v39  ;;  %v1101_v2 = vmax.f32 %v1041_v63, 0.0  ;;  %v3028_v63 = vld [vmem:[%s3249_s5] ss:$0 sm:$0xff] }
 0x1ae   : > { %v1102_v49 = vmax.f32 %v1044_v0, 0.0  ;;  %v2130_v4 = vpop.f32.mrb[64].mxu1 }
 0x1af   : > { %v2131_v5 = vpop.f32.mrb[65].mxu1 }
 0x1b0   : > { %v1122_v54 = vpack.c.bf16 %v1102_v49, %v1101_v2  ;;  %v2132_v10 = vadd.f32 %v2131_v5, %v2130_v4  ;;  %v2133_v11 = vpop.f32.mrb[66].mxu1 }
 0x1b1   : > { %v2134_v15 = vpop.f32.mrb[67].mxu1 }
 0x1b2   : > { %v1049_v17 = vadd.f32 %v2132_v10, %v888_v7  ;;  %v2135_v18 = vadd.f32 %v2134_v15, %v2133_v11  ;;  %2203 = vmatmul.mubr.msk.bf16.gmra.mrb[68].mxu0 %vm1166_vm0, %v1122_v54 }
 0x1b4   : > { %v1052_v19 = vadd.f32 %v2135_v18, %v891_v6  ;;  %v1103_v62 = vmax.f32 %v1049_v17, 0.0 }
 0x1b6   : > { %v1104_v21 = vmax.f32 %v1052_v19, 0.0  ;;  %v2136_v22 = vpop.f32.mrb[68].mxu1 }
 0x1b7   : > { %v2137_v12 = vpop.f32.mrb[69].mxu1 }
 0x1b8   : > { %v1123_v38 = vpack.c.bf16 %v1104_v21, %v1103_v62  ;;  %v2138_v24 = vadd.f32 %v2137_v12, %v2136_v22  ;;  %v2139_v25 = vpop.f32.mrb[70].mxu1 }
 0x1b9   : > { %v2140_v9 = vpop.f32.mrb[71].mxu1 }
 0x1ba   : > { %v1057_v41 = vadd.f32 %v2138_v24, %v896_v3  ;;  %v2141_v29 = vadd.f32 %v2140_v9, %v2139_v25  ;;  %2206 = vmatprep.mubr.msk.bf16.mxu0 %vm1166_vm0, %v1123_v38 }
 0x1bc   : > { %v1060_v16 = vadd.f32 %v2141_v29, %v899_v28  ;;  %v1105_v30 = vmax.f32 %v1057_v41, 0.0 }
 0x1be   : > { %v1106_v32 = vmax.f32 %v1060_v16, 0.0  ;;  %v2142_v33 = vpop.f32.mrb[72].mxu1 }
 0x1bf   : > { %v2143_v34 = vpop.f32.mrb[73].mxu1 }
 0x1c0   : > { %v1124_v48 = vpack.c.bf16 %v1106_v32, %v1105_v30  ;;  %v2144_v36 = vadd.f32 %v2143_v34, %v2142_v33  ;;  %v2145_v37 = vpop.f32.mrb[74].mxu1 }
 0x1c1   : > { %v2146_v40 = vpop.f32.mrb[75].mxu1 }
 0x1c2   : > { %v1065_v53 = vadd.f32 %v2144_v36, %v904_v20  ;;  %v2147_v42 = vadd.f32 %v2146_v40, %v2145_v37  ;;  %2207 = vmatmul.mubr.msk.bf16.gmra.mrb[72].mxu0 %vm1166_vm0, %v1124_v48 }
 0x1c4   : > { %v1068_v26 = vadd.f32 %v2147_v42, %v907_v23  ;;  %v1107_v43 = vmax.f32 %v1065_v53, 0.0 }
 0x1c6   : > { %v1108_v27 = vmax.f32 %v1068_v26, 0.0  ;;  %v2148_v45 = vpop.f32.mrb[76].mxu1 }
 0x1c7   : > { %v2149_v35 = vpop.f32.mrb[77].mxu1 }
 0x1c8   : > { %v1125_v60 = vpack.c.bf16 %v1108_v27, %v1107_v43  ;;  %v2150_v31 = vadd.f32 %v2149_v35, %v2148_v45  ;;  %v2151_v50 = vpop.f32.mrb[78].mxu1 }
 0x1c9   : > { %v2152_v51 = vpop.f32.mrb[79].mxu1 }
 0x1ca   : > { %v1073_v1 = vadd.f32 %v2150_v31, %v912_v46  ;;  %v2153_v55 = vadd.f32 %v2152_v51, %v2151_v50  ;;  %2210 = vmatprep.mubr.msk.bf16.mxu0 %vm1166_vm0, %v1125_v60 }
 0x1cc   : > { %v1076_v56 = vadd.f32 %v2153_v55, %v915_v52  ;;  %v1109_v57 = vmax.f32 %v1073_v1, 0.0 }
 0x1ce   : > { %v1110_v47 = vmax.f32 %v1076_v56, 0.0 }
 0x1d0   : > { %v1126_v39 = vpack.c.bf16 %v1110_v47, %v1109_v57 }
 0x1d2   : > { %2211 = vmatmul.mubr.msk.bf16.gmra.mrb[76].mxu0 %vm1166_vm0, %v1126_v39 }
 0x235   : > { %v2184_v59 = vpop.f32.mrb[48].mxu0 }
 0x236   : > { %v1258_v61 = vadd.f32 %v2184_v59, %v3021_v8  ;;  %v1249_v58 = vpop.f32.mrb[49].mxu0 }
 0x237   : > { %v1250_v13 = vadd.f32 %v3021_v8, %v1249_v58  ;;  %v2185_v14 = vpop.f32.mrb[50].mxu0 }
 0x238   : > { %v1378_v44 = vmax.f32 %v1258_v61, 0.0  ;;  %v1261_v0 = vadd.f32 %v2185_v14, %v3021_v8  ;;  %v1252_v2 = vpop.f32.mrb[51].mxu0 }
 0x239   : > { %v1376_v49 = vmax.f32 %v1250_v13, 0.0  ;;  %v1253_v4 = vadd.f32 %v3021_v8, %v1252_v2 }
 0x23a   : > { %v1379_v5 = vmax.f32 %v1261_v0, 0.0  ;;  %v1417_v7 = vmul.f32 %v3028_v63, %v1378_v44 }
 0x23b   : > { %v1377_v54 = vmax.f32 %v1253_v4, 0.0  ;;  %v1415_v10 = vmul.f32 %v3028_v63, %v1376_v49 }
 0x23c   : > { %v1454_v11 = vsel %vm1447_vm1, %v1417_v7, 0.0  ;;  %v1418_v15 = vmul.f32 %v3028_v63, %v1379_v5 }
 0x23d   : > { %1455 = vadd.xlane.f32.xlu1 %v1454_v11  ;;  %v1448_v6 = vsel %vm1447_vm1, %v1415_v10, 0.0  ;;  %v1416_v17 = vmul.f32 %v3028_v63, %v1377_v54 }
 0x23e   : > { %1449 = vadd.xlane.f32.xlu0 %v1448_v6  ;;  %v1457_v18 = vsel %vm1447_vm1, %v1418_v15, 0.0 }
 0x23f   : > { %v1451_v19 = vsel %vm1447_vm1, %v1416_v17, 0.0 }
 0x241   : > { %1458 = vadd.xlane.f32.xlu1 %v1457_v18 }
 0x242   : > { %1452 = vadd.xlane.f32.xlu0 %v1451_v19 }
 0x245   : > { %v2188_v62 = vpop.f32.mrb[52].mxu0 }
 0x246   : > { %v1274_v21 = vadd.f32 %v2188_v62, %v3021_v8  ;;  %v1265_v22 = vpop.f32.mrb[53].mxu0 }
 0x247   : > { %v1266_v12 = vadd.f32 %v3021_v8, %v1265_v22  ;;  %v2189_v3 = vpop.f32.mrb[54].mxu0 }
 0x248   : > { %v1382_v38 = vmax.f32 %v1274_v21, 0.0  ;;  %v1277_v24 = vadd.f32 %v2189_v3, %v3021_v8  ;;  %v1268_v25 = vpop.f32.mrb[55].mxu0 }
 0x249   : > { %v1380_v9 = vmax.f32 %v1266_v12, 0.0  ;;  %v1269_v28 = vadd.f32 %v3021_v8, %v1268_v25 }
 0x24a   : > { %v1383_v41 = vmax.f32 %v1277_v24, 0.0  ;;  %v1421_v29 = vmul.f32 %v3028_v63, %v1382_v38 }
 0x24b   : > { %v1381_v16 = vmax.f32 %v1269_v28, 0.0  ;;  %v1419_v33 = vmul.f32 %v3028_v63, %v1380_v9 }
 0x24c   : > { %v1466_v30 = vsel %vm1447_vm1, %v1421_v29, 0.0  ;;  %v1422_v32 = vmul.f32 %v3028_v63, %v1383_v41 }
 0x24d   : > { %1467 = vadd.xlane.f32.xlu0 %v1466_v30  ;;  %v1420_v20 = vmul.f32 %v3028_v63, %v1381_v16  ;;  %v1460_v48 = vsel %vm1447_vm1, %v1419_v33, 0.0 }
 0x24e   : > { %v1469_v34 = vsel %vm1447_vm1, %v1422_v32, 0.0 }
 0x24f   : > { %1470 = vadd.xlane.f32.xlu1 %v1469_v34  ;;  %v1463_v36 = vsel %vm1447_vm1, %v1420_v20, 0.0 }
 0x251   : > { %1461 = vadd.xlane.f32.xlu0 %v1460_v48 }
 0x253   : > { %1464 = vadd.xlane.f32.xlu1 %v1463_v36 }
 0x255   : > { %v2192_v37 = vpop.f32.mrb[56].mxu0 }
 0x256   : > { %v1290_v40 = vadd.f32 %v2192_v37, %v3021_v8  ;;  %v1281_v23 = vpop.f32.mrb[57].mxu0 }
 0x257   : > { %v1282_v53 = vadd.f32 %v3021_v8, %v1281_v23  ;;  %v2193_v42 = vpop.f32.mrb[58].mxu0 }
 0x258   : > { %v1386_v26 = vmax.f32 %v1290_v40, 0.0  ;;  %v1293_v43 = vadd.f32 %v2193_v42, %v3021_v8  ;;  %v1284_v27 = vpop.f32.mrb[59].mxu0 }
 0x259   : > { %v1384_v45 = vmax.f32 %v1282_v53, 0.0  ;;  %v1285_v35 = vadd.f32 %v3021_v8, %v1284_v27 }
 0x25a   : > { %v1387_v46 = vmax.f32 %v1293_v43, 0.0  ;;  %v1425_v60 = vmul.f32 %v3028_v63, %v1386_v26 }
 0x25b   : > { %v1385_v31 = vmax.f32 %v1285_v35, 0.0  ;;  %v1423_v52 = vmul.f32 %v3028_v63, %v1384_v45 }
 0x25c   : > { %v1478_v50 = vsel %vm1447_vm1, %v1425_v60, 0.0  ;;  %v1426_v51 = vmul.f32 %v3028_v63, %v1387_v46 }
 0x25d   : > { %1479 = vadd.xlane.f32.xlu0 %v1478_v50  ;;  %v1424_v55 = vmul.f32 %v3028_v63, %v1385_v31  ;;  %v1472_v56 = vsel %vm1447_vm1, %v1423_v52, 0.0 }
 0x25e   : > { %v1481_v1 = vsel %vm1447_vm1, %v1426_v51, 0.0 }
 0x25f   : > { %1482 = vadd.xlane.f32.xlu1 %v1481_v1  ;;  %v1475_v57 = vsel %vm1447_vm1, %v1424_v55, 0.0 }
 0x261   : > { %1473 = vadd.xlane.f32.xlu0 %v1472_v56 }
 0x263   : > { %1476 = vadd.xlane.f32.xlu1 %v1475_v57 }
 0x265   : > { %v2196_v47 = vpop.f32.mrb[60].mxu0 }
 0x266   : > { %v1306_v39 = vadd.f32 %v2196_v47, %v3021_v8  ;;  %v1297_v59 = vpop.f32.mrb[61].mxu0 }
 0x267   : > { %v1298_v61 = vadd.f32 %v3021_v8, %v1297_v59  ;;  %v2197_v58 = vpop.f32.mrb[62].mxu0 }
 0x268   : > { %v1390_v13 = vmax.f32 %v1306_v39, 0.0  ;;  %v1309_v14 = vadd.f32 %v2197_v58, %v3021_v8  ;;  %v1300_v44 = vpop.f32.mrb[63].mxu0 }
 0x269   : > { %v1388_v0 = vmax.f32 %v1298_v61, 0.0  ;;  %v1301_v2 = vadd.f32 %v3021_v8, %v1300_v44 }
 0x26a   : > { %v1391_v49 = vmax.f32 %v1309_v14, 0.0  ;;  %v1429_v4 = vmul.f32 %v3028_v63, %v1390_v13 }
 0x26b   : > { %v1389_v5 = vmax.f32 %v1301_v2, 0.0  ;;  %v1427_v10 = vmul.f32 %v3028_v63, %v1388_v0 }
 0x26c   : > { %v1490_v7 = vsel %vm1447_vm1, %v1429_v4, 0.0  ;;  %v1430_v54 = vmul.f32 %v3028_v63, %v1391_v49 }
 0x26d   : > { %1491 = vadd.xlane.f32.xlu0 %v1490_v7  ;;  %v1428_v15 = vmul.f32 %v3028_v63, %v1389_v5  ;;  %v1484_v6 = vsel %vm1447_vm1, %v1427_v10, 0.0 }
 0x26e   : > { %v1493_v11 = vsel %vm1447_vm1, %v1430_v54, 0.0 }
 0x26f   : > { %1494 = vadd.xlane.f32.xlu1 %v1493_v11  ;;  %v1487_v17 = vsel %vm1447_vm1, %v1428_v15, 0.0 }
 0x271   : > { %1485 = vadd.xlane.f32.xlu0 %v1484_v6 }
 0x273   : > { %1488 = vadd.xlane.f32.xlu1 %v1487_v17 }
 0x275   : > { %v2200_v18 = vpop.f32.mrb[64].mxu0 }
 0x276   : > { %v1322_v19 = vadd.f32 %v2200_v18, %v3021_v8  ;;  %v1313_v62 = vpop.f32.mrb[65].mxu0 }
 0x277   : > { %v1314_v21 = vadd.f32 %v3021_v8, %v1313_v62  ;;  %v2201_v22 = vpop.f32.mrb[66].mxu0 }
 0x278   : > { %v1394_v12 = vmax.f32 %v1322_v19, 0.0  ;;  %v1325_v3 = vadd.f32 %v2201_v22, %v3021_v8  ;;  %v1316_v38 = vpop.f32.mrb[67].mxu0 }
 0x279   : > { %v1392_v24 = vmax.f32 %v1314_v21, 0.0  ;;  %v1317_v25 = vadd.f32 %v3021_v8, %v1316_v38 }
 0x27a   : > { %v1395_v9 = vmax.f32 %v1325_v3, 0.0  ;;  %v1433_v28 = vmul.f32 %v3028_v63, %v1394_v12 }
 0x27b   : > { %v1393_v41 = vmax.f32 %v1317_v25, 0.0  ;;  %v1431_v30 = vmul.f32 %v3028_v63, %v1392_v24 }
 0x27c   : > { %v1502_v29 = vsel %vm1447_vm1, %v1433_v28, 0.0  ;;  %v1434_v16 = vmul.f32 %v3028_v63, %v1395_v9 }
 0x27d   : > { %1503 = vadd.xlane.f32.xlu0 %v1502_v29  ;;  %v1432_v33 = vmul.f32 %v3028_v63, %v1393_v41  ;;  %v1496_v34 = vsel %vm1447_vm1, %v1431_v30, 0.0 }
 0x27e   : > { %v1505_v32 = vsel %vm1447_vm1, %v1434_v16, 0.0 }
 0x27f   : > { %1506 = vadd.xlane.f32.xlu1 %v1505_v32  ;;  %v1499_v20 = vsel %vm1447_vm1, %v1432_v33, 0.0  ;;  %v3124_v33 = vstv %s1544_s17 }
 0x281   : > { %1497 = vadd.xlane.f32.xlu0 %v1496_v34 }
 0x283   : > { %1500 = vadd.xlane.f32.xlu1 %v1499_v20 }
 0x285   : > { %v2204_v48 = vpop.f32.mrb[68].mxu0 }
 0x286   : > { %v1338_v36 = vadd.f32 %v2204_v48, %v3021_v8  ;;  %v1329_v37 = vpop.f32.mrb[69].mxu0 }
 0x287   : > { %v1330_v40 = vadd.f32 %v3021_v8, %v1329_v37  ;;  %v2205_v23 = vpop.f32.mrb[70].mxu0 }
 0x288   : > { %v1398_v53 = vmax.f32 %v1338_v36, 0.0  ;;  %v1341_v42 = vadd.f32 %v2205_v23, %v3021_v8  ;;  %v1332_v26 = vpop.f32.mrb[71].mxu0 }
 0x289   : > { %v1396_v43 = vmax.f32 %v1330_v40, 0.0  ;;  %v1333_v27 = vadd.f32 %v3021_v8, %v1332_v26 }
 0x28a   : > { %v1399_v45 = vmax.f32 %v1341_v42, 0.0  ;;  %v1437_v35 = vmul.f32 %v3028_v63, %v1398_v53 }
 0x28b   : > { %v1397_v46 = vmax.f32 %v1333_v27, 0.0  ;;  %v1435_v50 = vmul.f32 %v3028_v63, %v1396_v43 }
 0x28c   : > { %v1514_v60 = vsel %vm1447_vm1, %v1437_v35, 0.0  ;;  %v1438_v31 = vmul.f32 %v3028_v63, %v1399_v45 }
 0x28d   : > { %1515 = vadd.xlane.f32.xlu0 %v1514_v60  ;;  %v1436_v52 = vmul.f32 %v3028_v63, %v1397_v46  ;;  %v1508_v1 = vsel %vm1447_vm1, %v1435_v50, 0.0 }
 0x28e   : > { %v1517_v51 = vsel %vm1447_vm1, %v1438_v31, 0.0 }
 0x28f   : > { %1518 = vadd.xlane.f32.xlu1 %v1517_v51  ;;  %v1511_v55 = vsel %vm1447_vm1, %v1436_v52, 0.0 }
 0x291   : > { %1509 = vadd.xlane.f32.xlu0 %v1508_v1 }
 0x293   : > { %1512 = vadd.xlane.f32.xlu1 %v1511_v55 }
 0x295   : > { %v2208_v56 = vpop.f32.mrb[72].mxu0 }
 0x296   : > { %v1354_v57 = vadd.f32 %v2208_v56, %v3021_v8  ;;  %v1345_v47 = vpop.f32.mrb[73].mxu0 }
 0x297   : > { %v1346_v39 = vadd.f32 %v3021_v8, %v1345_v47  ;;  %v2209_v59 = vpop.f32.mrb[74].mxu0 }
 0x298   : > { %v1402_v61 = vmax.f32 %v1354_v57, 0.0  ;;  %v1357_v58 = vadd.f32 %v2209_v59, %v3021_v8  ;;  %v1348_v13 = vpop.f32.mrb[75].mxu0 }
 0x299   : > { %v1400_v14 = vmax.f32 %v1346_v39, 0.0  ;;  %v1349_v44 = vadd.f32 %v3021_v8, %v1348_v13 }
 0x29a   : > { %v1403_v0 = vmax.f32 %v1357_v58, 0.0  ;;  %v1441_v2 = vmul.f32 %v3028_v63, %v1402_v61 }
 0x29b   : > { %v1401_v49 = vmax.f32 %v1349_v44, 0.0  ;;  %v1439_v7 = vmul.f32 %v3028_v63, %v1400_v14 }
 0x29c   : > { %v1526_v4 = vsel %vm1447_vm1, %v1441_v2, 0.0  ;;  %v1442_v5 = vmul.f32 %v3028_v63, %v1403_v0 }
 0x29d   : > { %1527 = vadd.xlane.f32.xlu0 %v1526_v4  ;;  %v1440_v10 = vmul.f32 %v3028_v63, %v1401_v49  ;;  %v1520_v11 = vsel %vm1447_vm1, %v1439_v7, 0.0 }
 0x29e   : > { %v1529_v54 = vsel %vm1447_vm1, %v1442_v5, 0.0 }
 0x29f   : > { %1530 = vadd.xlane.f32.xlu1 %v1529_v54  ;;  %v1523_v15 = vsel %vm1447_vm1, %v1440_v10, 0.0 }
 0x2a1   : > { %1521 = vadd.xlane.f32.xlu0 %v1520_v11 }
 0x2a3   : > { %1524 = vadd.xlane.f32.xlu1 %v1523_v15 }
 0x2a5   : > { %v2212_v6 = vpop.f32.mrb[76].mxu0 }
 0x2a6   : > { %v1370_v17 = vadd.f32 %v2212_v6, %v3021_v8  ;;  %v1361_v18 = vpop.f32.mrb[77].mxu0 }
 0x2a7   : > { %v1362_v19 = vadd.f32 %v3021_v8, %v1361_v18  ;;  %v2213_v62 = vpop.f32.mrb[78].mxu0 }
 0x2a8   : > { %v1373_v21 = vadd.f32 %v2213_v62, %v3021_v8  ;;  %v1364_v22 = vpop.f32.mrb[79].mxu0  ;;  %v1406_v12 = vmax.f32 %v1370_v17, 0.0 }
 0x2a9   : > { %v1404_v3 = vmax.f32 %v1362_v19, 0.0  ;;  %v1365_v38 = vadd.f32 %v3021_v8, %v1364_v22 }
 0x2aa   : > { %v1407_v24 = vmax.f32 %v1373_v21, 0.0  ;;  %v1445_v29 = vmul.f32 %v3028_v63, %v1406_v12 }
 0x2ab   : > { %v1405_v25 = vmax.f32 %v1365_v38, 0.0  ;;  %v1443_v9 = vmul.f32 %v3028_v63, %v1404_v3 }
 0x2ac   : > { %v1446_v30 = vmul.f32 %v3028_v63, %v1407_v24  ;;  %v1538_v32 = vsel %vm1447_vm1, %v1445_v29, 0.0 }
 0x2ad   : > { %v1532_v28 = vsel %vm1447_vm1, %v1443_v9, 0.0  ;;  %v1444_v41 = vmul.f32 %v3028_v63, %v1405_v25 }
 0x2ae   : > { %1533 = vadd.xlane.f32.xlu0 %v1532_v28  ;;  %v1541_v8 = vsel %vm1447_vm1, %v1446_v30, 0.0 }
 0x2af   : > { %v1535_v16 = vsel %vm1447_vm1, %v1444_v41, 0.0 }
 0x2b0   : > { %1536 = vadd.xlane.f32.xlu1 %v1535_v16 }
 0x2b2   : > { %1539 = vadd.xlane.f32.xlu0 %v1538_v32 }
 0x2b4   : > { %1542 = vadd.xlane.f32.xlu1 %v1541_v8 }
 0x2ca   : > { %v1456_v34 = vpop.xlane.xlu1 %1455 }
 0x2cb   : > { %v1548_v20 = vadd.f32 %v3124_v33, %v1456_v34  ;;  %v1450_v48 = vpop.xlane.xlu0 %1449 }
 0x2cc   : > { %v1546_v36 = vadd.f32 %v3124_v33, %v1450_v48 }
 0x2cd   : > { %v1580_v37 = vsub.f32 0.0, %v1548_v20 }
 0x2ce   : > { %v1578_v40 = vsub.f32 0.0, %v1546_v36  ;;  %v1459_v23 = vpop.xlane.xlu1 %1458 }
 0x2cf   : > { %v1614_v63 = vmul.f32 1.442695, %v1580_v37  ;;  %v1549_v53 = vadd.f32 %v3124_v33, %v1459_v23  ;;  %v1453_v42 = vpop.xlane.xlu0 %1452 }
 0x2d0   : > { %v1610_v26 = vmul.f32 1.442695, %v1578_v40  ;;  %v1547_v43 = vadd.f32 %v3124_v33, %v1453_v42 }
 0x2d1   : > { %2316 = vpow2.f32 %v1614_v63  ;;  %v1581_v27 = vsub.f32 0.0, %v1549_v53 }
 0x2d2   : > { %2318 = vpow2.f32 %v1610_v26  ;;  %v1579_v45 = vsub.f32 0.0, %v1547_v43 }
 0x2d3   : > { %v1616_v35 = vmul.f32 1.442695, %v1581_v27 }
 0x2d4   : > { %v1612_v46 = vmul.f32 1.442695, %v1579_v45 }
 0x2d5   : > { %2320 = vpow2.f32 %v1616_v35 }
 0x2d6   : > { %2322 = vpow2.f32 %v1612_v46 }
 0x2da   : > { %v1468_v60 = vpop.xlane.xlu0 %1467 }
 0x2db   : > { %v2317_v31 = vpop.eup %2316  ;;  %v1552_v50 = vadd.f32 %v3124_v33, %v1468_v60 }
 0x2dc   : > { %v2319_v51 = vpop.eup %2318  ;;  %v1676_v52 = vadd.f32 1.0, %v2317_v31  ;;  %v1471_v1 = vpop.xlane.xlu1 %1470 }
 0x2dd   : > { %v1674_v55 = vadd.f32 1.0, %v2319_v51  ;;  %v1584_v56 = vsub.f32 0.0, %v1552_v50  ;;  %v1553_v57 = vadd.f32 %v3124_v33, %v1471_v1 }
 0x2de   : > { %2324 = vrcp.f32 %v1676_v52  ;;  %v1462_v47 = vpop.xlane.xlu0 %1461 }
 0x2df   : > { %v2321_v39 = vpop.eup %2320  ;;  %2326 = vrcp.f32 %v1674_v55  ;;  %v1622_v59 = vmul.f32 1.442695, %v1584_v56  ;;  %v1585_v61 = vsub.f32 0.0, %v1553_v57  ;;  %v1550_v58 = vadd.f32 %v3124_v33, %v1462_v47 }
 0x2e0   : > { %v2323_v13 = vpop.eup %2322  ;;  %v1677_v14 = vadd.f32 1.0, %v2321_v39  ;;  %v1465_v44 = vpop.xlane.xlu1 %1464 }
 0x2e1   : > { %v1675_v0 = vadd.f32 1.0, %v2323_v13  ;;  %2328 = vpow2.f32 %v1622_v59  ;;  %v1624_v2 = vmul.f32 1.442695, %v1585_v61  ;;  %v1582_v49 = vsub.f32 0.0, %v1550_v58 }
 0x2e2   : > { %2330 = vrcp.f32 %v1677_v14  ;;  %v1551_v4 = vadd.f32 %v3124_v33, %v1465_v44 }
 0x2e3   : > { %2332 = vrcp.f32 %v1675_v0  ;;  %v1618_v5 = vmul.f32 1.442695, %v1582_v49 }
 0x2e4   : > { %2334 = vpow2.f32 %v1624_v2  ;;  %v1583_v7 = vsub.f32 0.0, %v1551_v4 }
 0x2e5   : > { %2336 = vpow2.f32 %v1618_v5 }
 0x2e6   : > { %v1620_v54 = vmul.f32 1.442695, %v1583_v7 }
 0x2e8   : > { %v2325_v10 = vpop.eup %2324  ;;  %2338 = vpow2.f32 %v1620_v54 }
 0x2e9   : > { %v2327_v11 = vpop.eup %2326  ;;  %1740 = vst [vmem:[%s3135_s23 + $0x10] sm:$0xff] %v2325_v10 }
 0x2ea   : > { %1738 = vst [vmem:[%s3135_s23] sm:$0xff] %v2327_v11  ;;  %v1480_v15 = vpop.xlane.xlu0 %1479 }
 0x2eb   : > { %v2329_v6 = vpop.eup %2328  ;;  %v1556_v17 = vadd.f32 %v3124_v33, %v1480_v15 }
 0x2ec   : > { %v2331_v18 = vpop.eup %2330  ;;  %v1680_v19 = vadd.f32 1.0, %v2329_v6  ;;  %v1483_v62 = vpop.xlane.xlu1 %1482 }
 0x2ed   : > { %v2333_v21 = vpop.eup %2332  ;;  %1741 = vst [vmem:[%s3135_s23 + $0x18] sm:$0xff] %v2331_v18  ;;  %v1588_v22 = vsub.f32 0.0, %v1556_v17  ;;  %v1557_v12 = vadd.f32 %v3124_v33, %v1483_v62 }
 0x2ee   : > { %v2335_v3 = vpop.eup %2334  ;;  %1739 = vst [vmem:[%s3135_s23 + $0x8] sm:$0xff] %v2333_v21  ;;  %2340 = vrcp.f32 %v1680_v19  ;;  %v1474_v38 = vpop.xlane.xlu0 %1473 }
 0x2ef   : > { %v2337_v24 = vpop.eup %2336  ;;  %v1681_v25 = vadd.f32 1.0, %v2335_v3  ;;  %v1630_v9 = vmul.f32 1.442695, %v1588_v22  ;;  %v1589_v28 = vsub.f32 0.0, %v1557_v12  ;;  %v1554_v41 = vadd.f32 %v3124_v33, %v1474_v38 }
 0x2f0   : > { %v1678_v29 = vadd.f32 1.0, %v2337_v24  ;;  %v1477_v16 = vpop.xlane.xlu1 %1476 }
 0x2f1   : > { %2342 = vrcp.f32 %v1681_v25  ;;  %v1632_v30 = vmul.f32 1.442695, %v1589_v28  ;;  %v1586_v32 = vsub.f32 0.0, %v1554_v41  ;;  %v1555_v8 = vadd.f32 %v3124_v33, %v1477_v16 }
 0x2f2   : > { %v2339_v34 = vpop.eup %2338  ;;  %2344 = vrcp.f32 %v1678_v29 }
 0x2f3   : > { %v1679_v20 = vadd.f32 1.0, %v2339_v34  ;;  %2346 = vpow2.f32 %v1630_v9  ;;  %v1626_v48 = vmul.f32 1.442695, %v1586_v32  ;;  %v1587_v36 = vsub.f32 0.0, %v1555_v8 }
 0x2f4   : > { %2348 = vpow2.f32 %v1632_v30 }
 0x2f5   : > { %2350 = vrcp.f32 %v1679_v20  ;;  %v1628_v37 = vmul.f32 1.442695, %v1587_v36 }
 0x2f6   : > { %2352 = vpow2.f32 %v1626_v48 }
 0x2f7   : > { %2354 = vpow2.f32 %v1628_v37 }
 0x2f8   : > { %v2341_v40 = vpop.eup %2340 }
 0x2f9   : > { %1744 = vst [vmem:[%s3135_s23 + $0x30] sm:$0xff] %v2341_v40 }
 0x2fa   : > { %v1492_v23 = vpop.xlane.xlu0 %1491 }
 0x2fb   : > { %v2343_v63 = vpop.eup %2342  ;;  %v1560_v53 = vadd.f32 %v3124_v33, %v1492_v23 }
 0x2fc   : > { %v2345_v42 = vpop.eup %2344  ;;  %1745 = vst [vmem:[%s3135_s23 + $0x38] sm:$0xff] %v2343_v63  ;;  %v1495_v26 = vpop.xlane.xlu1 %1494 }
 0x2fd   : > { %v2347_v43 = vpop.eup %2346  ;;  %1742 = vst [vmem:[%s3135_s23 + $0x20] sm:$0xff] %v2345_v42  ;;  %v1592_v27 = vsub.f32 0.0, %v1560_v53  ;;  %v1561_v45 = vadd.f32 %v3124_v33, %v1495_v26 }
 0x2fe   : > { %v2349_v35 = vpop.eup %2348  ;;  %v1684_v46 = vadd.f32 1.0, %v2347_v43  ;;  %v1486_v60 = vpop.xlane.xlu0 %1485 }
 0x2ff   : > { %v2351_v31 = vpop.eup %2350  ;;  %v1685_v50 = vadd.f32 1.0, %v2349_v35  ;;  %v1638_v51 = vmul.f32 1.442695, %v1592_v27  ;;  %v1593_v52 = vsub.f32 0.0, %v1561_v45  ;;  %v1558_v1 = vadd.f32 %v3124_v33, %v1486_v60 }
 0x300   : > { %v2353_v55 = vpop.eup %2352  ;;  %1743 = vst [vmem:[%s3135_s23 + $0x28] sm:$0xff] %v2351_v31  ;;  %2356 = vrcp.f32 %v1684_v46  ;;  %v1489_v56 = vpop.xlane.xlu1 %1488 }
 0x301   : > { %v2355_v57 = vpop.eup %2354  ;;  %2358 = vrcp.f32 %v1685_v50  ;;  %v1682_v47 = vadd.f32 1.0, %v2353_v55  ;;  %v1640_v39 = vmul.f32 1.442695, %v1593_v52  ;;  %v1590_v59 = vsub.f32 0.0, %v1558_v1 }
 0x302   : > { %v1683_v61 = vadd.f32 1.0, %v2355_v57  ;;  %2360 = vpow2.f32 %v1638_v51  ;;  %v1559_v58 = vadd.f32 %v3124_v33, %v1489_v56 }
 0x303   : > { %2362 = vrcp.f32 %v1682_v47  ;;  %v1634_v13 = vmul.f32 1.442695, %v1590_v59 }
 0x304   : > { %2364 = vrcp.f32 %v1683_v61  ;;  %v1591_v14 = vsub.f32 0.0, %v1559_v58 }
 0x305   : > { %2366 = vpow2.f32 %v1640_v39 }
 0x306   : > { %2368 = vpow2.f32 %v1634_v13  ;;  %v1636_v44 = vmul.f32 1.442695, %v1591_v14 }
 0x308   : > { %2370 = vpow2.f32 %v1636_v44 }
 0x30a   : > { %v2357_v0 = vpop.eup %2356  ;;  %v1504_v2 = vpop.xlane.xlu0 %1503 }
 0x30b   : > { %v2359_v49 = vpop.eup %2358  ;;  %1748 = vst [vmem:[%s3135_s23 + $0x50] sm:$0xff] %v2357_v0  ;;  %v1564_v4 = vadd.f32 %v3124_v33, %v1504_v2 }
 0x30c   : > { %v2361_v5 = vpop.eup %2360  ;;  %1749 = vst [vmem:[%s3135_s23 + $0x58] sm:$0xff] %v2359_v49  ;;  %v1507_v7 = vpop.xlane.xlu1 %1506 }
 0x30d   : > { %v2363_v54 = vpop.eup %2362  ;;  %v1688_v10 = vadd.f32 1.0, %v2361_v5  ;;  %v1596_v11 = vsub.f32 0.0, %v1564_v4  ;;  %v1565_v15 = vadd.f32 %v3124_v33, %v1507_v7 }
 0x30e   : > { %v2365_v6 = vpop.eup %2364  ;;  %1746 = vst [vmem:[%s3135_s23 + $0x40] sm:$0xff] %v2363_v54  ;;  %v1498_v17 = vpop.xlane.xlu0 %1497 }
 0x30f   : > { %v2367_v18 = vpop.eup %2366  ;;  %1747 = vst [vmem:[%s3135_s23 + $0x48] sm:$0xff] %v2365_v6  ;;  %2372 = vrcp.f32 %v1688_v10  ;;  %v1646_v19 = vmul.f32 1.442695, %v1596_v11  ;;  %v1597_v62 = vsub.f32 0.0, %v1565_v15  ;;  %v1562_v21 = vadd.f32 %v3124_v33, %v1498_v17 }
 0x310   : > { %v2369_v22 = vpop.eup %2368  ;;  %v1689_v12 = vadd.f32 1.0, %v2367_v18  ;;  %v1501_v3 = vpop.xlane.xlu1 %1500 }
 0x311   : > { %v1686_v38 = vadd.f32 1.0, %v2369_v22  ;;  %2374 = vpow2.f32 %v1646_v19  ;;  %v1648_v24 = vmul.f32 1.442695, %v1597_v62  ;;  %v1594_v25 = vsub.f32 0.0, %v1562_v21 }
 0x312   : > { %v2371_v9 = vpop.eup %2370  ;;  %2376 = vrcp.f32 %v1689_v12  ;;  %v1563_v28 = vadd.f32 %v3124_v33, %v1501_v3 }
 0x313   : > { %2378 = vrcp.f32 %v1686_v38  ;;  %v1687_v41 = vadd.f32 1.0, %v2371_v9  ;;  %v1642_v29 = vmul.f32 1.442695, %v1594_v25 }
 0x314   : > { %2380 = vpow2.f32 %v1648_v24  ;;  %v1595_v16 = vsub.f32 0.0, %v1563_v28 }
 0x315   : > { %2382 = vrcp.f32 %v1687_v41 }
 0x316   : > { %2384 = vpow2.f32 %v1642_v29  ;;  %v1644_v30 = vmul.f32 1.442695, %v1595_v16 }
 0x318   : > { %2386 = vpow2.f32 %v1644_v30 }
 0x319   : > { %v2373_v32 = vpop.eup %2372 }
 0x31a   : > { %1752 = vst [vmem:[%s3135_s23 + $0x70] sm:$0xff] %v2373_v32  ;;  %v1516_v8 = vpop.xlane.xlu0 %1515 }
 0x31b   : > { %v2375_v34 = vpop.eup %2374  ;;  %v1568_v20 = vadd.f32 %v3124_v33, %v1516_v8 }
 0x31c   : > { %v2377_v48 = vpop.eup %2376  ;;  %v1692_v36 = vadd.f32 1.0, %v2375_v34  ;;  %v1519_v37 = vpop.xlane.xlu1 %1518 }
 0x31d   : > { %v2379_v40 = vpop.eup %2378  ;;  %1753 = vst [vmem:[%s3135_s23 + $0x78] sm:$0xff] %v2377_v48  ;;  %v1600_v23 = vsub.f32 0.0, %v1568_v20  ;;  %v1569_v63 = vadd.f32 %v3124_v33, %v1519_v37 }
 0x31e   : > { %v2381_v53 = vpop.eup %2380  ;;  %1750 = vst [vmem:[%s3135_s23 + $0x60] sm:$0xff] %v2379_v40  ;;  %2388 = vrcp.f32 %v1692_v36  ;;  %v1510_v42 = vpop.xlane.xlu0 %1509 }
 0x31f   : > { %v2383_v26 = vpop.eup %2382  ;;  %v1693_v43 = vadd.f32 1.0, %v2381_v53  ;;  %v1654_v27 = vmul.f32 1.442695, %v1600_v23  ;;  %v1601_v45 = vsub.f32 0.0, %v1569_v63  ;;  %v1566_v35 = vadd.f32 %v3124_v33, %v1510_v42 }
 0x320   : > { %v2385_v46 = vpop.eup %2384  ;;  %1751 = vst [vmem:[%s3135_s23 + $0x68] sm:$0xff] %v2383_v26  ;;  %v1513_v60 = vpop.xlane.xlu1 %1512 }
 0x321   : > { %2390 = vrcp.f32 %v1693_v43  ;;  %v1690_v31 = vadd.f32 1.0, %v2385_v46  ;;  %v1656_v50 = vmul.f32 1.442695, %v1601_v45  ;;  %v1598_v51 = vsub.f32 0.0, %v1566_v35 }
 0x322   : > { %v2387_v52 = vpop.eup %2386  ;;  %2392 = vpow2.f32 %v1654_v27  ;;  %v1567_v1 = vadd.f32 %v3124_v33, %v1513_v60 }
 0x323   : > { %2394 = vrcp.f32 %v1690_v31  ;;  %v1691_v55 = vadd.f32 1.0, %v2387_v52  ;;  %v1650_v56 = vmul.f32 1.442695, %v1598_v51 }
 0x324   : > { %2396 = vpow2.f32 %v1656_v50  ;;  %v1599_v57 = vsub.f32 0.0, %v1567_v1 }
 0x325   : > { %2398 = vrcp.f32 %v1691_v55 }
 0x326   : > { %2400 = vpow2.f32 %v1650_v56  ;;  %v1652_v47 = vmul.f32 1.442695, %v1599_v57 }
 0x328   : > { %v2389_v39 = vpop.eup %2388  ;;  %2402 = vpow2.f32 %v1652_v47 }
 0x329   : > { %1756 = vst [vmem:[%s3135_s23 + $0x90] sm:$0xff] %v2389_v39 }
 0x32a   : > { %v1528_v59 = vpop.xlane.xlu0 %1527 }
 0x32b   : > { %v2391_v61 = vpop.eup %2390  ;;  %v1572_v58 = vadd.f32 %v3124_v33, %v1528_v59 }
 0x32c   : > { %v2393_v13 = vpop.eup %2392  ;;  %1757 = vst [vmem:[%s3135_s23 + $0x98] sm:$0xff] %v2391_v61  ;;  %v1531_v14 = vpop.xlane.xlu1 %1530 }
 0x32d   : > { %v2395_v44 = vpop.eup %2394  ;;  %v1696_v0 = vadd.f32 1.0, %v2393_v13  ;;  %v1604_v2 = vsub.f32 0.0, %v1572_v58  ;;  %v1573_v49 = vadd.f32 %v3124_v33, %v1531_v14 }
 0x32e   : > { %v2397_v4 = vpop.eup %2396  ;;  %1754 = vst [vmem:[%s3135_s23 + $0x80] sm:$0xff] %v2395_v44  ;;  %v1522_v5 = vpop.xlane.xlu0 %1521 }
 0x32f   : > { %v2399_v7 = vpop.eup %2398  ;;  %2404 = vrcp.f32 %v1696_v0  ;;  %v1697_v54 = vadd.f32 1.0, %v2397_v4  ;;  %v1662_v10 = vmul.f32 1.442695, %v1604_v2  ;;  %v1605_v11 = vsub.f32 0.0, %v1573_v49 }
 0x330   : > { %v2401_v15 = vpop.eup %2400  ;;  %1755 = vst [vmem:[%s3135_s23 + $0x88] sm:$0xff] %v2399_v7  ;;  %v1570_v6 = vadd.f32 %v3124_v33, %v1522_v5  ;;  %v1525_v17 = vpop.xlane.xlu1 %1524 }
 0x331   : > { %2406 = vrcp.f32 %v1697_v54  ;;  %v1694_v18 = vadd.f32 1.0, %v2401_v15  ;;  %v1664_v19 = vmul.f32 1.442695, %v1605_v11  ;;  %v1571_v62 = vadd.f32 %v3124_v33, %v1525_v17 }
 0x332   : > { %v2403_v21 = vpop.eup %2402  ;;  %2408 = vpow2.f32 %v1662_v10  ;;  %v1602_v22 = vsub.f32 0.0, %v1570_v6 }
 0x333   : > { %2410 = vrcp.f32 %v1694_v18  ;;  %v1695_v12 = vadd.f32 1.0, %v2403_v21  ;;  %v1603_v3 = vsub.f32 0.0, %v1571_v62 }
 0x334   : > { %2412 = vpow2.f32 %v1664_v19  ;;  %v1658_v38 = vmul.f32 1.442695, %v1602_v22 }
 0x335   : > { %2414 = vrcp.f32 %v1695_v12  ;;  %v1660_v24 = vmul.f32 1.442695, %v1603_v3 }
 0x336   : > { %2416 = vpow2.f32 %v1658_v38 }
 0x337   : > { %2418 = vpow2.f32 %v1660_v24 }
 0x339   : > { %v2405_v25 = vpop.eup %2404 }
 0x33a   : > { %1760 = vst [vmem:[%s3135_s23 + $0xb0] sm:$0xff] %v2405_v25 }
 0x33b   : > { %v2407_v9 = vpop.eup %2406  ;;  %v1534_v28 = vpop.xlane.xlu0 %1533 }
 0x33c   : > { %v2409_v41 = vpop.eup %2408  ;;  %1761 = vst [vmem:[%s3135_s23 + $0xb8] sm:$0xff] %v2407_v9  ;;  %v1574_v29 = vadd.f32 %v3124_v33, %v1534_v28 }
 0x33d   : > { %v2411_v16 = vpop.eup %2410  ;;  %v1700_v30 = vadd.f32 1.0, %v2409_v41  ;;  %v1537_v32 = vpop.xlane.xlu1 %1536 }
 0x33e   : > { %v2413_v8 = vpop.eup %2412  ;;  %1758 = vst [vmem:[%s3135_s23 + $0xa0] sm:$0xff] %v2411_v16  ;;  %v1606_v34 = vsub.f32 0.0, %v1574_v29  ;;  %v1575_v20 = vadd.f32 %v3124_v33, %v1537_v32 }
 0x33f   : > { %v2415_v48 = vpop.eup %2414  ;;  %2420 = vrcp.f32 %v1700_v30  ;;  %v1701_v36 = vadd.f32 1.0, %v2413_v8  ;;  %v1540_v37 = vpop.xlane.xlu0 %1539 }
 0x340   : > { %v2417_v40 = vpop.eup %2416  ;;  %1759 = vst [vmem:[%s3135_s23 + $0xa8] sm:$0xff] %v2415_v48  ;;  %v1666_v23 = vmul.f32 1.442695, %v1606_v34  ;;  %v1607_v63 = vsub.f32 0.0, %v1575_v20  ;;  %v1576_v53 = vadd.f32 %v3124_v33, %v1540_v37 }
 0x341   : > { %v2419_v42 = vpop.eup %2418  ;;  %2422 = vrcp.f32 %v1701_v36  ;;  %v1698_v26 = vadd.f32 1.0, %v2417_v40  ;;  %v1543_v43 = vpop.xlane.xlu1 %1542 }
 0x342   : > { %v1699_v27 = vadd.f32 1.0, %v2419_v42  ;;  %2424 = vpow2.f32 %v1666_v23  ;;  %v1668_v45 = vmul.f32 1.442695, %v1607_v63  ;;  %v1608_v35 = vsub.f32 0.0, %v1576_v53 }
 0x343   : > { %2426 = vrcp.f32 %v1698_v26  ;;  %v1577_v46 = vadd.f32 %v3124_v33, %v1543_v43 }
 0x344   : > { %2428 = vrcp.f32 %v1699_v27  ;;  %v1670_v60 = vmul.f32 1.442695, %v1608_v35 }
 0x345   : > { %2430 = vpow2.f32 %v1668_v45  ;;  %v1609_v31 = vsub.f32 0.0, %v1577_v46 }
 0x346   : > { %2432 = vpow2.f32 %v1670_v60 }
 0x347   : > { %v1672_v50 = vmul.f32 1.442695, %v1609_v31 }
 0x349   : > { %v2421_v51 = vpop.eup %2420  ;;  %2434 = vpow2.f32 %v1672_v50 }
 0x34a   : > { %1764 = vst [vmem:[%s3135_s23 + $0xd0] sm:$0xff] %v2421_v51 }
 0x34b   : > { %v2423_v52 = vpop.eup %2422 }
 0x34c   : > { %v2425_v1 = vpop.eup %2424  ;;  %1765 = vst [vmem:[%s3135_s23 + $0xd8] sm:$0xff] %v2423_v52 }
 0x34d   : > { %v2427_v55 = vpop.eup %2426  ;;  %v1702_v56 = vadd.f32 1.0, %v2425_v1 }
 0x34e   : > { %v2429_v57 = vpop.eup %2428  ;;  %1762 = vst [vmem:[%s3135_s23 + $0xc0] sm:$0xff] %v2427_v55 }
 0x34f   : > { %v2431_v33 = vpop.eup %2430  ;;  %1763 = vst [vmem:[%s3135_s23 + $0xc8] sm:$0xff] %v2429_v57  ;;  %2436 = vrcp.f32 %v1702_v56 }
 0x350   : > { %v2433_v47 = vpop.eup %2432  ;;  %v1703_v39 = vadd.f32 1.0, %v2431_v33 }
 0x351   : > { %v1704_v59 = vadd.f32 1.0, %v2433_v47 }
 0x352   : > { %2438 = vrcp.f32 %v1703_v39 }
 0x353   : > { %v2435_v61 = vpop.eup %2434  ;;  %2440 = vrcp.f32 %v1704_v59 }
 0x354   : > { %v1705_v58 = vadd.f32 1.0, %v2435_v61 }
 0x356   : > { %2442 = vrcp.f32 %v1705_v58 }
 0x359   : > { %v2437_v13 = vpop.eup %2436 }
 0x35a   : > { %1766 = vst [vmem:[%s3135_s23 + $0xe0] sm:$0xff] %v2437_v13 }
 0x35c   : > { %v2439_v14 = vpop.eup %2438 }
 0x35d   : > { %v2441_v44 = vpop.eup %2440  ;;  %1767 = vst [vmem:[%s3135_s23 + $0xe8] sm:$0xff] %v2439_v14 }
 0x35e   : > { %1768 = vst [vmem:[%s3135_s23 + $0xf0] sm:$0xff] %v2441_v44 }
 0x360   : > { %v2443_v0 = vpop.eup %2442 }
 0x361   : > { %1769 = vst [vmem:[%s3135_s23 + $0xf8] sm:$0xff] %v2443_v0 }
 0x362   : > { %2487 = shalt.err (!%p2484_p2)
}
 0x363   : > { %s2488_s9 = scalar_lea.hbm %s3197_s20, 4096  ;;  %s2492_s21 = scalar_lea.hbm %s3251_s7, 8192 }
 0x364   : > { %p2489_p4 = scmp.ne.s32.totalorder %s3197_s20, %s2488_s9  ;;  %p2493_p9 = scmp.lt.u32.totalorder %s3197_s20, %s3251_s7 }
 0x365   : > { %p2494_p1 = scmp.lt.u32.totalorder %s2492_s21, %s2488_s9  ;;  %p2496_p6 = scmp.lt.u32.totalorder %s2488_s9, %s3197_s20 }
 0x366   : > { %p2490_p5 = pnand %p2489_p4, %p3258_p11 }
 0x367   : > { %p2495_p3 = por %p2494_p1, %p2493_p9 }
 0x368   : > { %p2491_p7 = pneg %p2490_p5 }
 0x369   : > { %p2497_p12 = por %p2496_p6, %p2495_p3 }
 0x36b   : > { %p2498_p13 = pnand %p2497_p12, %p2491_p7 }
 0x36d   : > { %2501 = shalt.err (!%p2498_p13)
}
 0x36e   : > { %s2546_s16 = smov 128   ;;  %s2547_s19 = smov 8  }
 0x36f   : > { %2232 = dma.vmem_to_hbm [thread:$0]  (%p3258_p11), %s3199_s25, 4096, %s3197_s20, %s1771_s18, %s2546_s16, %s2546_s16, %s2547_s19  }
 0x370 PF: > { %s1799_s22 = sand.u32 1, %s2528_s26   ;;  %p3259_p8 = scmp.ne.s32.totalorder %s3256_s15, 0 }
 0x371   : > { %p3260_p10 = scmp.ge.s32.totalorder %s2540_s29, 2  ;;  %s1800_s6 = scalar_lea.sflag [#allocation5], %s1799_s22 }
 0x373   : > { %p2239_p0 = pnand %p3260_p10, %p3259_p8 }
 0x375   : > { %2523 = dma.done.wait (!%p2239_p0), %s1800_s6, 4096  }
 0x376   : > { %2525 = vsyncadd (!%p2239_p0), %s1800_s6, 4294963200  ;;  %p21_p2 = scmp.ge.s32.totalorder %s2616_s8, 4   ;;  %s3261_s26 = smov %s2532_s27 }
 0x377   : > { %s3262_s27 = smov %s2536_s28  ;;  %s3263_s28 = smov %s2628_s11 }
 0x378   : > { %s3264_s29 = smov %s2616_s8  ;;  %23 = sbr.rel (!%p21_p2) target bundleno = 7 (0x7), region = 93 }
 0x37f   :  { %1805 = vsyncpa [#allocation4], 1 }
 0x380   :  { %1807 = vsyncpa [#allocation4 + $0x1], 1 }
 0x381   :  { %1808 = vsyncpa [#allocation5], 1 }
 0x382   :  { %1810 = vsyncpa [#allocation5 + $0x1], 1 }

</bundles_post_ra>
